<compile_context>
chip_gen: v6e
topology: v6e:2x2x1
jax: 0.10.0
libtpu: 0.0.40
codegen_flags: <defaults>
</compile_context>

<pallas_src>
import functools

import jax
import jax.numpy as jnp
from jax.experimental import pallas as pl
from jax.experimental.pallas import tpu as pltpu


def _conv3x3_kernel(*refs, td, h, wp):
    """Computes `td` consecutive output depth planes for one batch element.

    refs[0 .. td+1] : (1, 1, Cin, P)    padded depth planes db*td + j, channels-first,
                                        each plane flattened row-major with row stride wp
    refs[td+2]      : (3, Cout, 9*Cin)  per-depth-tap folded weights, rows ordered (kh, kw, cin)
    refs[td+3]      : (Cout, 1)         bias
    refs[td+4]      : (1, td, Cout, S)  output, S = h*wp (lane-dense; 2 junk cols per row)
    """
    slab_refs = refs[: td + 2]
    w_ref = refs[td + 2]
    b_ref = refs[td + 3]
    o_ref = refs[td + 4]
    s = h * wp

    # For every padded depth plane, gather its 9 (kh, kw) taps once.  Because the
    # halo columns live inside the flattened row stride, every tap is a contiguous
    # static lane slice (no masks, no lane-wise packing of Cin-wide slivers).  The
    # 9 (Cin, S) pieces stack along sublanes into a (9*Cin, S) block that is reused
    # by up to 3 output planes.
    blocks = []
    for r in slab_refs:
        plane = r[0, 0]                                          # (Cin, P)
        pieces = [plane[:, kh * wp + kw: kh * wp + kw + s]       # (Cin, S)
                  for kh in range(3) for kw in range(3)]
        blocks.append(jnp.concatenate(pieces, axis=0))           # (9*Cin, S)

    bias = b_ref[...].astype(jnp.float32)                        # (Cout, 1)
    for t in range(td):
        acc = bias                                               # broadcast over lanes
        for kd in range(3):                                      # fold the depth taps
            acc = acc + jnp.dot(w_ref[kd], blocks[t + kd],
                                preferred_element_type=jnp.float32)
        o_ref[0, t] = acc.astype(o_ref.dtype)                    # (Cout, S) lane-dense store


def _make_slab_index_map(td, j):
    def idx(nb, db):
        # depth block size is 1, so the block index IS the padded-plane index.
        return (nb, db * td + j, 0, 0)
    return idx


def conv3x3(x, weight, bias, *, depth_tile=None):
    """3D conv, kernel 3, stride 1, zero padding 1 — matches nn.Conv3d(..., 3, padding=1).

    x:      (N, Cin, D, H, W)  float32 (NCDHW, PyTorch convention)
    weight: (Cout, Cin, 3, 3, 3)
    bias:   (Cout,)
    returns (N, Cout, D, H, W)
    """
    n, cin, d, h, w = x.shape
    cout = weight.shape[0]
    wp = w + 2                      # padded row stride (halo kept inside the flatten)
    s = h * wp                      # per-plane matmul / store width (incl. 2 junk cols/row)
    p = (h + 3) * wp                # padded plane length (+1 extra zero row so the
                                    #  (kh=2, kw=2) tap slice stays in bounds)

    if depth_tile is None:
        depth_tile = max(t for t in (4, 2, 1) if d % t == 0)
    td = depth_tile
    assert d % td == 0, "depth_tile must divide D"

    # ---- layout glue in plain JAX (one fused pad+transpose, no tap replication) ----
    # (N, Cin, D, H, W) -> (N, D, Cin, H, W); zero-pad D by 1, H by (1, 2), W by 1;
    # flatten each padded plane so its long spatial axis is the lane axis.
    x_t = jnp.transpose(x, (0, 2, 1, 3, 4))
    x_pad = jnp.pad(x_t, ((0, 0), (1, 1), (0, 0), (1, 2), (1, 1)))
    x_flat = x_pad.reshape(n, d + 2, cin, p)                 # (N, D+2, Cin, P)

    # Weights folded per depth tap: (3, Cout, 9*Cin), contraction rows ordered (kh, kw, cin)
    # to match the in-kernel tap gather order.
    w_f = jnp.transpose(weight, (2, 0, 3, 4, 1)).reshape(3, cout, 9 * cin)
    b = bias.reshape(cout, 1)

    n_slabs = td + 2
    slab_specs = [
        pl.BlockSpec((1, 1, cin, p), _make_slab_index_map(td, j))
        for j in range(n_slabs)
    ]

    out = pl.pallas_call(
        functools.partial(_conv3x3_kernel, td=td, h=h, wp=wp),
        out_shape=jax.ShapeDtypeStruct((n, d, cout, s), x.dtype),
        grid_spec=pltpu.PrefetchScalarGridSpec(
            num_scalar_prefetch=0,
            grid=(n, d // td),
            in_specs=slab_specs + [
                pl.BlockSpec((3, cout, 9 * cin), lambda nb, db: (0, 0, 0)),  # resident weights
                pl.BlockSpec((cout, 1), lambda nb, db: (0, 0)),              # resident bias
            ],
            out_specs=pl.BlockSpec((1, td, cout, s), lambda nb, db: (nb, db, 0, 0)),
        ),
        compiler_params=pltpu.CompilerParams(
            dimension_semantics=("parallel", "parallel")),
    )(*([x_flat] * n_slabs), w_f, b)

    # Strip the 2 junk columns per row and go back to NCDHW.
    out = out.reshape(n, d, cout, h, wp)[..., :w]            # (N, D, Cout, H, W)
    return jnp.transpose(out, (0, 2, 1, 3, 4))               # (N, Cout, D, H, W)


if __name__ == "__main__":
    key = jax.random.PRNGKey(0)
    k1, k2, k3 = jax.random.split(key, 3)

    # Small 3D volume consistent with nn.Conv3d forward: (N, C, D, H, W)
    N, Cin, Cout, D, H, W = 2, 4, 8, 8, 16, 16
    x = jax.random.normal(k1, (N, Cin, D, H, W), jnp.float32)
    # Deterministic synthetic parameters (shapes from nn.Conv3d(in, out, 3, padding=1))
    weight = jax.random.normal(k2, (Cout, Cin, 3, 3, 3), jnp.float32) * 0.1
    bias = jax.random.normal(k3, (Cout,), jnp.float32) * 0.1

    out = jax.block_until_ready(conv3x3(x, weight, bias))

    # Reference check against XLA conv (same semantics as torch.nn.Conv3d)
    ref = jax.lax.conv_general_dilated(
        x, weight, window_strides=(1, 1, 1), padding=((1, 1), (1, 1), (1, 1)),
        dimension_numbers=("NCDHW", "OIDHW", "NCDHW"))
    ref = ref + bias.reshape(1, Cout, 1, 1, 1)

    assert out.shape == (N, Cout, D, H, W)
    assert jnp.allclose(out, ref, atol=1e-4, rtol=1e-4)
    print("KERNEL_OK")
</pallas_src>

<mosaic_0001>
module attributes {stable_mosaic.version = 11 : i64} {
  func.func @_conv3x3_kernel(%arg0: i32, %arg1: i32, %arg2: memref<1x1x4x342xf32, #tpu.memory_space<vmem>>, %arg3: memref<1x1x4x342xf32, #tpu.memory_space<vmem>>, %arg4: memref<1x1x4x342xf32, #tpu.memory_space<vmem>>, %arg5: memref<1x1x4x342xf32, #tpu.memory_space<vmem>>, %arg6: memref<1x1x4x342xf32, #tpu.memory_space<vmem>>, %arg7: memref<1x1x4x342xf32, #tpu.memory_space<vmem>>, %arg8: memref<3x8x36xf32, #tpu.memory_space<vmem>>, %arg9: memref<8x1xf32, #tpu.memory_space<vmem>>, %arg10: memref<1x4x8x288xf32, #tpu.memory_space<vmem>>) attributes {dimension_semantics = [#tpu.dimension_semantics<parallel>, #tpu.dimension_semantics<parallel>], iteration_bounds = array<i64: 2, 2>, scalar_prefetch = 0 : i64, scratch_operands = 0 : i64, tpu.core_type = #tpu.core_type<tc>, window_params = [{transform_indices = @transform_0, window_bounds = array<i64: 1, 1, 4, 342>}, {transform_indices = @transform_1, window_bounds = array<i64: 1, 1, 4, 342>}, {transform_indices = @transform_2, window_bounds = array<i64: 1, 1, 4, 342>}, {transform_indices = @transform_3, window_bounds = array<i64: 1, 1, 4, 342>}, {transform_indices = @transform_4, window_bounds = array<i64: 1, 1, 4, 342>}, {transform_indices = @transform_5, window_bounds = array<i64: 1, 1, 4, 342>}, {pipeline_mode = #tpu.pipeline_mode<synchronous>, transform_indices = @transform_6, window_bounds = array<i64: 3, 8, 36>}, {pipeline_mode = #tpu.pipeline_mode<synchronous>, transform_indices = @transform_7, window_bounds = array<i64: 8, 1>}, {transform_indices = @transform_8, window_bounds = array<i64: 1, 4, 8, 288>}]} {
    %c0 = arith.constant 0 : index
    %c0_0 = arith.constant 0 : index
    %c0_1 = arith.constant 0 : index
    %c0_2 = arith.constant 0 : index
    %0 = vector.load %arg2[%c0, %c0_0, %c0_1, %c0_2] : memref<1x1x4x342xf32, #tpu.memory_space<vmem>>, vector<1x1x4x342xf32>
    %1 = vector.shape_cast %0 : vector<1x1x4x342xf32> to vector<4x342xf32>
    %2 = vector.extract_strided_slice %1 {offsets = [0, 0], sizes = [4, 288], strides = [1, 1]} : vector<4x342xf32> to vector<4x288xf32>
    %3 = vector.extract_strided_slice %1 {offsets = [0, 1], sizes = [4, 288], strides = [1, 1]} : vector<4x342xf32> to vector<4x288xf32>
    %4 = vector.extract_strided_slice %1 {offsets = [0, 2], sizes = [4, 288], strides = [1, 1]} : vector<4x342xf32> to vector<4x288xf32>
    %5 = vector.extract_strided_slice %1 {offsets = [0, 18], sizes = [4, 288], strides = [1, 1]} : vector<4x342xf32> to vector<4x288xf32>
    %6 = vector.extract_strided_slice %1 {offsets = [0, 19], sizes = [4, 288], strides = [1, 1]} : vector<4x342xf32> to vector<4x288xf32>
    %7 = vector.extract_strided_slice %1 {offsets = [0, 20], sizes = [4, 288], strides = [1, 1]} : vector<4x342xf32> to vector<4x288xf32>
    %8 = vector.extract_strided_slice %1 {offsets = [0, 36], sizes = [4, 288], strides = [1, 1]} : vector<4x342xf32> to vector<4x288xf32>
    %9 = vector.extract_strided_slice %1 {offsets = [0, 37], sizes = [4, 288], strides = [1, 1]} : vector<4x342xf32> to vector<4x288xf32>
    %10 = vector.extract_strided_slice %1 {offsets = [0, 38], sizes = [4, 288], strides = [1, 1]} : vector<4x342xf32> to vector<4x288xf32>
    %11 = tpu.concatenate %2, %3, %4, %5, %6, %7, %8, %9, %10 in 0 : vector<4x288xf32>, vector<4x288xf32>, vector<4x288xf32>, vector<4x288xf32>, vector<4x288xf32>, vector<4x288xf32>, vector<4x288xf32>, vector<4x288xf32>, vector<4x288xf32> -> vector<36x288xf32>
    %c0_3 = arith.constant 0 : index
    %c0_4 = arith.constant 0 : index
    %c0_5 = arith.constant 0 : index
    %c0_6 = arith.constant 0 : index
    %12 = vector.load %arg3[%c0_3, %c0_4, %c0_5, %c0_6] : memref<1x1x4x342xf32, #tpu.memory_space<vmem>>, vector<1x1x4x342xf32>
    %13 = vector.shape_cast %12 : vector<1x1x4x342xf32> to vector<4x342xf32>
    %14 = vector.extract_strided_slice %13 {offsets = [0, 0], sizes = [4, 288], strides = [1, 1]} : vector<4x342xf32> to vector<4x288xf32>
    %15 = vector.extract_strided_slice %13 {offsets = [0, 1], sizes = [4, 288], strides = [1, 1]} : vector<4x342xf32> to vector<4x288xf32>
    %16 = vector.extract_strided_slice %13 {offsets = [0, 2], sizes = [4, 288], strides = [1, 1]} : vector<4x342xf32> to vector<4x288xf32>
    %17 = vector.extract_strided_slice %13 {offsets = [0, 18], sizes = [4, 288], strides = [1, 1]} : vector<4x342xf32> to vector<4x288xf32>
    %18 = vector.extract_strided_slice %13 {offsets = [0, 19], sizes = [4, 288], strides = [1, 1]} : vector<4x342xf32> to vector<4x288xf32>
    %19 = vector.extract_strided_slice %13 {offsets = [0, 20], sizes = [4, 288], strides = [1, 1]} : vector<4x342xf32> to vector<4x288xf32>
    %20 = vector.extract_strided_slice %13 {offsets = [0, 36], sizes = [4, 288], strides = [1, 1]} : vector<4x342xf32> to vector<4x288xf32>
    %21 = vector.extract_strided_slice %13 {offsets = [0, 37], sizes = [4, 288], strides = [1, 1]} : vector<4x342xf32> to vector<4x288xf32>
    %22 = vector.extract_strided_slice %13 {offsets = [0, 38], sizes = [4, 288], strides = [1, 1]} : vector<4x342xf32> to vector<4x288xf32>
    %23 = tpu.concatenate %14, %15, %16, %17, %18, %19, %20, %21, %22 in 0 : vector<4x288xf32>, vector<4x288xf32>, vector<4x288xf32>, vector<4x288xf32>, vector<4x288xf32>, vector<4x288xf32>, vector<4x288xf32>, vector<4x288xf32>, vector<4x288xf32> -> vector<36x288xf32>
    %c0_7 = arith.constant 0 : index
    %c0_8 = arith.constant 0 : index
    %c0_9 = arith.constant 0 : index
    %c0_10 = arith.constant 0 : index
    %24 = vector.load %arg4[%c0_7, %c0_8, %c0_9, %c0_10] : memref<1x1x4x342xf32, #tpu.memory_space<vmem>>, vector<1x1x4x342xf32>
    %25 = vector.shape_cast %24 : vector<1x1x4x342xf32> to vector<4x342xf32>
    %26 = vector.extract_strided_slice %25 {offsets = [0, 0], sizes = [4, 288], strides = [1, 1]} : vector<4x342xf32> to vector<4x288xf32>
    %27 = vector.extract_strided_slice %25 {offsets = [0, 1], sizes = [4, 288], strides = [1, 1]} : vector<4x342xf32> to vector<4x288xf32>
    %28 = vector.extract_strided_slice %25 {offsets = [0, 2], sizes = [4, 288], strides = [1, 1]} : vector<4x342xf32> to vector<4x288xf32>
    %29 = vector.extract_strided_slice %25 {offsets = [0, 18], sizes = [4, 288], strides = [1, 1]} : vector<4x342xf32> to vector<4x288xf32>
    %30 = vector.extract_strided_slice %25 {offsets = [0, 19], sizes = [4, 288], strides = [1, 1]} : vector<4x342xf32> to vector<4x288xf32>
    %31 = vector.extract_strided_slice %25 {offsets = [0, 20], sizes = [4, 288], strides = [1, 1]} : vector<4x342xf32> to vector<4x288xf32>
    %32 = vector.extract_strided_slice %25 {offsets = [0, 36], sizes = [4, 288], strides = [1, 1]} : vector<4x342xf32> to vector<4x288xf32>
    %33 = vector.extract_strided_slice %25 {offsets = [0, 37], sizes = [4, 288], strides = [1, 1]} : vector<4x342xf32> to vector<4x288xf32>
    %34 = vector.extract_strided_slice %25 {offsets = [0, 38], sizes = [4, 288], strides = [1, 1]} : vector<4x342xf32> to vector<4x288xf32>
    %35 = tpu.concatenate %26, %27, %28, %29, %30, %31, %32, %33, %34 in 0 : vector<4x288xf32>, vector<4x288xf32>, vector<4x288xf32>, vector<4x288xf32>, vector<4x288xf32>, vector<4x288xf32>, vector<4x288xf32>, vector<4x288xf32>, vector<4x288xf32> -> vector<36x288xf32>
    %c0_11 = arith.constant 0 : index
    %c0_12 = arith.constant 0 : index
    %c0_13 = arith.constant 0 : index
    %c0_14 = arith.constant 0 : index
    %36 = vector.load %arg5[%c0_11, %c0_12, %c0_13, %c0_14] : memref<1x1x4x342xf32, #tpu.memory_space<vmem>>, vector<1x1x4x342xf32>
    %37 = vector.shape_cast %36 : vector<1x1x4x342xf32> to vector<4x342xf32>
    %38 = vector.extract_strided_slice %37 {offsets = [0, 0], sizes = [4, 288], strides = [1, 1]} : vector<4x342xf32> to vector<4x288xf32>
    %39 = vector.extract_strided_slice %37 {offsets = [0, 1], sizes = [4, 288], strides = [1, 1]} : vector<4x342xf32> to vector<4x288xf32>
    %40 = vector.extract_strided_slice %37 {offsets = [0, 2], sizes = [4, 288], strides = [1, 1]} : vector<4x342xf32> to vector<4x288xf32>
    %41 = vector.extract_strided_slice %37 {offsets = [0, 18], sizes = [4, 288], strides = [1, 1]} : vector<4x342xf32> to vector<4x288xf32>
    %42 = vector.extract_strided_slice %37 {offsets = [0, 19], sizes = [4, 288], strides = [1, 1]} : vector<4x342xf32> to vector<4x288xf32>
    %43 = vector.extract_strided_slice %37 {offsets = [0, 20], sizes = [4, 288], strides = [1, 1]} : vector<4x342xf32> to vector<4x288xf32>
    %44 = vector.extract_strided_slice %37 {offsets = [0, 36], sizes = [4, 288], strides = [1, 1]} : vector<4x342xf32> to vector<4x288xf32>
    %45 = vector.extract_strided_slice %37 {offsets = [0, 37], sizes = [4, 288], strides = [1, 1]} : vector<4x342xf32> to vector<4x288xf32>
    %46 = vector.extract_strided_slice %37 {offsets = [0, 38], sizes = [4, 288], strides = [1, 1]} : vector<4x342xf32> to vector<4x288xf32>
    %47 = tpu.concatenate %38, %39, %40, %41, %42, %43, %44, %45, %46 in 0 : vector<4x288xf32>, vector<4x288xf32>, vector<4x288xf32>, vector<4x288xf32>, vector<4x288xf32>, vector<4x288xf32>, vector<4x288xf32>, vector<4x288xf32>, vector<4x288xf32> -> vector<36x288xf32>
    %c0_15 = arith.constant 0 : index
    %c0_16 = arith.constant 0 : index
    %c0_17 = arith.constant 0 : index
    %c0_18 = arith.constant 0 : index
    %48 = vector.load %arg6[%c0_15, %c0_16, %c0_17, %c0_18] : memref<1x1x4x342xf32, #tpu.memory_space<vmem>>, vector<1x1x4x342xf32>
    %49 = vector.shape_cast %48 : vector<1x1x4x342xf32> to vector<4x342xf32>
    %50 = vector.extract_strided_slice %49 {offsets = [0, 0], sizes = [4, 288], strides = [1, 1]} : vector<4x342xf32> to vector<4x288xf32>
    %51 = vector.extract_strided_slice %49 {offsets = [0, 1], sizes = [4, 288], strides = [1, 1]} : vector<4x342xf32> to vector<4x288xf32>
    %52 = vector.extract_strided_slice %49 {offsets = [0, 2], sizes = [4, 288], strides = [1, 1]} : vector<4x342xf32> to vector<4x288xf32>
    %53 = vector.extract_strided_slice %49 {offsets = [0, 18], sizes = [4, 288], strides = [1, 1]} : vector<4x342xf32> to vector<4x288xf32>
    %54 = vector.extract_strided_slice %49 {offsets = [0, 19], sizes = [4, 288], strides = [1, 1]} : vector<4x342xf32> to vector<4x288xf32>
    %55 = vector.extract_strided_slice %49 {offsets = [0, 20], sizes = [4, 288], strides = [1, 1]} : vector<4x342xf32> to vector<4x288xf32>
    %56 = vector.extract_strided_slice %49 {offsets = [0, 36], sizes = [4, 288], strides = [1, 1]} : vector<4x342xf32> to vector<4x288xf32>
    %57 = vector.extract_strided_slice %49 {offsets = [0, 37], sizes = [4, 288], strides = [1, 1]} : vector<4x342xf32> to vector<4x288xf32>
    %58 = vector.extract_strided_slice %49 {offsets = [0, 38], sizes = [4, 288], strides = [1, 1]} : vector<4x342xf32> to vector<4x288xf32>
    %59 = tpu.concatenate %50, %51, %52, %53, %54, %55, %56, %57, %58 in 0 : vector<4x288xf32>, vector<4x288xf32>, vector<4x288xf32>, vector<4x288xf32>, vector<4x288xf32>, vector<4x288xf32>, vector<4x288xf32>, vector<4x288xf32>, vector<4x288xf32> -> vector<36x288xf32>
    %c0_19 = arith.constant 0 : index
    %c0_20 = arith.constant 0 : index
    %c0_21 = arith.constant 0 : index
    %c0_22 = arith.constant 0 : index
    %60 = vector.load %arg7[%c0_19, %c0_20, %c0_21, %c0_22] : memref<1x1x4x342xf32, #tpu.memory_space<vmem>>, vector<1x1x4x342xf32>
    %61 = vector.shape_cast %60 : vector<1x1x4x342xf32> to vector<4x342xf32>
    %62 = vector.extract_strided_slice %61 {offsets = [0, 0], sizes = [4, 288], strides = [1, 1]} : vector<4x342xf32> to vector<4x288xf32>
    %63 = vector.extract_strided_slice %61 {offsets = [0, 1], sizes = [4, 288], strides = [1, 1]} : vector<4x342xf32> to vector<4x288xf32>
    %64 = vector.extract_strided_slice %61 {offsets = [0, 2], sizes = [4, 288], strides = [1, 1]} : vector<4x342xf32> to vector<4x288xf32>
    %65 = vector.extract_strided_slice %61 {offsets = [0, 18], sizes = [4, 288], strides = [1, 1]} : vector<4x342xf32> to vector<4x288xf32>
    %66 = vector.extract_strided_slice %61 {offsets = [0, 19], sizes = [4, 288], strides = [1, 1]} : vector<4x342xf32> to vector<4x288xf32>
    %67 = vector.extract_strided_slice %61 {offsets = [0, 20], sizes = [4, 288], strides = [1, 1]} : vector<4x342xf32> to vector<4x288xf32>
    %68 = vector.extract_strided_slice %61 {offsets = [0, 36], sizes = [4, 288], strides = [1, 1]} : vector<4x342xf32> to vector<4x288xf32>
    %69 = vector.extract_strided_slice %61 {offsets = [0, 37], sizes = [4, 288], strides = [1, 1]} : vector<4x342xf32> to vector<4x288xf32>
    %70 = vector.extract_strided_slice %61 {offsets = [0, 38], sizes = [4, 288], strides = [1, 1]} : vector<4x342xf32> to vector<4x288xf32>
    %71 = tpu.concatenate %62, %63, %64, %65, %66, %67, %68, %69, %70 in 0 : vector<4x288xf32>, vector<4x288xf32>, vector<4x288xf32>, vector<4x288xf32>, vector<4x288xf32>, vector<4x288xf32>, vector<4x288xf32>, vector<4x288xf32>, vector<4x288xf32> -> vector<36x288xf32>
    %c0_23 = arith.constant 0 : index
    %c0_24 = arith.constant 0 : index
    %72 = vector.load %arg9[%c0_23, %c0_24] : memref<8x1xf32, #tpu.memory_space<vmem>>, vector<8x1xf32>
    %c0_25 = arith.constant 0 : index
    %c0_26 = arith.constant 0 : index
    %c0_27 = arith.constant 0 : index
    %73 = vector.load %arg8[%c0_25, %c0_26, %c0_27] : memref<3x8x36xf32, #tpu.memory_space<vmem>>, vector<1x8x36xf32>
    %74 = vector.shape_cast %73 : vector<1x8x36xf32> to vector<8x36xf32>
    %cst = arith.constant dense<0.000000e+00> : vector<8x288xf32>
    %75 = tpu.matmul %74, %11, %cst {dimension_numbers = #tpu.dot_dimension_numbers<[1], [0], [0], [1], [0, 0, 1, 1], [], []>} : vector<8x36xf32>, vector<36x288xf32>, vector<8x288xf32> -> vector<8x288xf32>
    %76 = vector.broadcast %72 : vector<8x1xf32> to vector<8x288xf32>
    %77 = arith.addf %76, %75 : vector<8x288xf32>
    %c1 = arith.constant 1 : index
    %c0_28 = arith.constant 0 : index
    %c0_29 = arith.constant 0 : index
    %78 = vector.load %arg8[%c1, %c0_28, %c0_29] : memref<3x8x36xf32, #tpu.memory_space<vmem>>, vector<1x8x36xf32>
    %79 = vector.shape_cast %78 : vector<1x8x36xf32> to vector<8x36xf32>
    %cst_30 = arith.constant dense<0.000000e+00> : vector<8x288xf32>
    %80 = tpu.matmul %79, %23, %cst_30 {dimension_numbers = #tpu.dot_dimension_numbers<[1], [0], [0], [1], [0, 0, 1, 1], [], []>} : vector<8x36xf32>, vector<36x288xf32>, vector<8x288xf32> -> vector<8x288xf32>
    %81 = arith.addf %77, %80 : vector<8x288xf32>
    %c2 = arith.constant 2 : index
    %c0_31 = arith.constant 0 : index
    %c0_32 = arith.constant 0 : index
    %82 = vector.load %arg8[%c2, %c0_31, %c0_32] : memref<3x8x36xf32, #tpu.memory_space<vmem>>, vector<1x8x36xf32>
    %83 = vector.shape_cast %82 : vector<1x8x36xf32> to vector<8x36xf32>
    %cst_33 = arith.constant dense<0.000000e+00> : vector<8x288xf32>
    %84 = tpu.matmul %83, %35, %cst_33 {dimension_numbers = #tpu.dot_dimension_numbers<[1], [0], [0], [1], [0, 0, 1, 1], [], []>} : vector<8x36xf32>, vector<36x288xf32>, vector<8x288xf32> -> vector<8x288xf32>
    %85 = arith.addf %81, %84 : vector<8x288xf32>
    %c0_34 = arith.constant 0 : index
    %c0_35 = arith.constant 0 : index
    %c0_36 = arith.constant 0 : index
    %c0_37 = arith.constant 0 : index
    %86 = vector.load %arg10[%c0_34, %c0_35, %c0_36, %c0_37] : memref<1x4x8x288xf32, #tpu.memory_space<vmem>>, vector<1x1x8x288xf32>
    %87 = vector.shape_cast %86 : vector<1x1x8x288xf32> to vector<8x288xf32>
    %88 = vector.shape_cast %85 : vector<8x288xf32> to vector<1x1x8x288xf32>
    tpu.vector_store %arg10[%c0_34, %c0_35, %c0_36, %c0_37], %88 {strides = array<i32>} : memref<1x4x8x288xf32, #tpu.memory_space<vmem>>, vector<1x1x8x288xf32>,
    %c0_38 = arith.constant 0 : index
    %c0_39 = arith.constant 0 : index
    %c0_40 = arith.constant 0 : index
    %89 = vector.load %arg8[%c0_38, %c0_39, %c0_40] : memref<3x8x36xf32, #tpu.memory_space<vmem>>, vector<1x8x36xf32>
    %90 = vector.shape_cast %89 : vector<1x8x36xf32> to vector<8x36xf32>
    %cst_41 = arith.constant dense<0.000000e+00> : vector<8x288xf32>
    %91 = tpu.matmul %90, %23, %cst_41 {dimension_numbers = #tpu.dot_dimension_numbers<[1], [0], [0], [1], [0, 0, 1, 1], [], []>} : vector<8x36xf32>, vector<36x288xf32>, vector<8x288xf32> -> vector<8x288xf32>
    %92 = vector.broadcast %72 : vector<8x1xf32> to vector<8x288xf32>
    %93 = arith.addf %92, %91 : vector<8x288xf32>
    %c1_42 = arith.constant 1 : index
    %c0_43 = arith.constant 0 : index
    %c0_44 = arith.constant 0 : index
    %94 = vector.load %arg8[%c1_42, %c0_43, %c0_44] : memref<3x8x36xf32, #tpu.memory_space<vmem>>, vector<1x8x36xf32>
    %95 = vector.shape_cast %94 : vector<1x8x36xf32> to vector<8x36xf32>
    %cst_45 = arith.constant dense<0.000000e+00> : vector<8x288xf32>
    %96 = tpu.matmul %95, %35, %cst_45 {dimension_numbers = #tpu.dot_dimension_numbers<[1], [0], [0], [1], [0, 0, 1, 1], [], []>} : vector<8x36xf32>, vector<36x288xf32>, vector<8x288xf32> -> vector<8x288xf32>
    %97 = arith.addf %93, %96 : vector<8x288xf32>
    %c2_46 = arith.constant 2 : index
    %c0_47 = arith.constant 0 : index
    %c0_48 = arith.constant 0 : index
    %98 = vector.load %arg8[%c2_46, %c0_47, %c0_48] : memref<3x8x36xf32, #tpu.memory_space<vmem>>, vector<1x8x36xf32>
    %99 = vector.shape_cast %98 : vector<1x8x36xf32> to vector<8x36xf32>
    %cst_49 = arith.constant dense<0.000000e+00> : vector<8x288xf32>
    %100 = tpu.matmul %99, %47, %cst_49 {dimension_numbers = #tpu.dot_dimension_numbers<[1], [0], [0], [1], [0, 0, 1, 1], [], []>} : vector<8x36xf32>, vector<36x288xf32>, vector<8x288xf32> -> vector<8x288xf32>
    %101 = arith.addf %97, %100 : vector<8x288xf32>
    %c0_50 = arith.constant 0 : index
    %c1_51 = arith.constant 1 : index
    %c0_52 = arith.constant 0 : index
    %c0_53 = arith.constant 0 : index
    %102 = vector.load %arg10[%c0_50, %c1_51, %c0_52, %c0_53] : memref<1x4x8x288xf32, #tpu.memory_space<vmem>>, vector<1x1x8x288xf32>
    %103 = vector.shape_cast %102 : vector<1x1x8x288xf32> to vector<8x288xf32>
    %104 = vector.shape_cast %101 : vector<8x288xf32> to vector<1x1x8x288xf32>
    tpu.vector_store %arg10[%c0_50, %c1_51, %c0_52, %c0_53], %104 {strides = array<i32>} : memref<1x4x8x288xf32, #tpu.memory_space<vmem>>, vector<1x1x8x288xf32>,
    %c0_54 = arith.constant 0 : index
    %c0_55 = arith.constant 0 : index
    %c0_56 = arith.constant 0 : index
    %105 = vector.load %arg8[%c0_54, %c0_55, %c0_56] : memref<3x8x36xf32, #tpu.memory_space<vmem>>, vector<1x8x36xf32>
    %106 = vector.shape_cast %105 : vector<1x8x36xf32> to vector<8x36xf32>
    %cst_57 = arith.constant dense<0.000000e+00> : vector<8x288xf32>
    %107 = tpu.matmul %106, %35, %cst_57 {dimension_numbers = #tpu.dot_dimension_numbers<[1], [0], [0], [1], [0, 0, 1, 1], [], []>} : vector<8x36xf32>, vector<36x288xf32>, vector<8x288xf32> -> vector<8x288xf32>
    %108 = vector.broadcast %72 : vector<8x1xf32> to vector<8x288xf32>
    %109 = arith.addf %108, %107 : vector<8x288xf32>
    %c1_58 = arith.constant 1 : index
    %c0_59 = arith.constant 0 : index
    %c0_60 = arith.constant 0 : index
    %110 = vector.load %arg8[%c1_58, %c0_59, %c0_60] : memref<3x8x36xf32, #tpu.memory_space<vmem>>, vector<1x8x36xf32>
    %111 = vector.shape_cast %110 : vector<1x8x36xf32> to vector<8x36xf32>
    %cst_61 = arith.constant dense<0.000000e+00> : vector<8x288xf32>
    %112 = tpu.matmul %111, %47, %cst_61 {dimension_numbers = #tpu.dot_dimension_numbers<[1], [0], [0], [1], [0, 0, 1, 1], [], []>} : vector<8x36xf32>, vector<36x288xf32>, vector<8x288xf32> -> vector<8x288xf32>
    %113 = arith.addf %109, %112 : vector<8x288xf32>
    %c2_62 = arith.constant 2 : index
    %c0_63 = arith.constant 0 : index
    %c0_64 = arith.constant 0 : index
    %114 = vector.load %arg8[%c2_62, %c0_63, %c0_64] : memref<3x8x36xf32, #tpu.memory_space<vmem>>, vector<1x8x36xf32>
    %115 = vector.shape_cast %114 : vector<1x8x36xf32> to vector<8x36xf32>
    %cst_65 = arith.constant dense<0.000000e+00> : vector<8x288xf32>
    %116 = tpu.matmul %115, %59, %cst_65 {dimension_numbers = #tpu.dot_dimension_numbers<[1], [0], [0], [1], [0, 0, 1, 1], [], []>} : vector<8x36xf32>, vector<36x288xf32>, vector<8x288xf32> -> vector<8x288xf32>
    %117 = arith.addf %113, %116 : vector<8x288xf32>
    %c0_66 = arith.constant 0 : index
    %c2_67 = arith.constant 2 : index
    %c0_68 = arith.constant 0 : index
    %c0_69 = arith.constant 0 : index
    %118 = vector.load %arg10[%c0_66, %c2_67, %c0_68, %c0_69] : memref<1x4x8x288xf32, #tpu.memory_space<vmem>>, vector<1x1x8x288xf32>
    %119 = vector.shape_cast %118 : vector<1x1x8x288xf32> to vector<8x288xf32>
    %120 = vector.shape_cast %117 : vector<8x288xf32> to vector<1x1x8x288xf32>
    tpu.vector_store %arg10[%c0_66, %c2_67, %c0_68, %c0_69], %120 {strides = array<i32>} : memref<1x4x8x288xf32, #tpu.memory_space<vmem>>, vector<1x1x8x288xf32>,
    %c0_70 = arith.constant 0 : index
    %c0_71 = arith.constant 0 : index
    %c0_72 = arith.constant 0 : index
    %121 = vector.load %arg8[%c0_70, %c0_71, %c0_72] : memref<3x8x36xf32, #tpu.memory_space<vmem>>, vector<1x8x36xf32>
    %122 = vector.shape_cast %121 : vector<1x8x36xf32> to vector<8x36xf32>
    %cst_73 = arith.constant dense<0.000000e+00> : vector<8x288xf32>
    %123 = tpu.matmul %122, %47, %cst_73 {dimension_numbers = #tpu.dot_dimension_numbers<[1], [0], [0], [1], [0, 0, 1, 1], [], []>} : vector<8x36xf32>, vector<36x288xf32>, vector<8x288xf32> -> vector<8x288xf32>
    %124 = vector.broadcast %72 : vector<8x1xf32> to vector<8x288xf32>
    %125 = arith.addf %124, %123 : vector<8x288xf32>
    %c1_74 = arith.constant 1 : index
    %c0_75 = arith.constant 0 : index
    %c0_76 = arith.constant 0 : index
    %126 = vector.load %arg8[%c1_74, %c0_75, %c0_76] : memref<3x8x36xf32, #tpu.memory_space<vmem>>, vector<1x8x36xf32>
    %127 = vector.shape_cast %126 : vector<1x8x36xf32> to vector<8x36xf32>
    %cst_77 = arith.constant dense<0.000000e+00> : vector<8x288xf32>
    %128 = tpu.matmul %127, %59, %cst_77 {dimension_numbers = #tpu.dot_dimension_numbers<[1], [0], [0], [1], [0, 0, 1, 1], [], []>} : vector<8x36xf32>, vector<36x288xf32>, vector<8x288xf32> -> vector<8x288xf32>
    %129 = arith.addf %125, %128 : vector<8x288xf32>
    %c2_78 = arith.constant 2 : index
    %c0_79 = arith.constant 0 : index
    %c0_80 = arith.constant 0 : index
    %130 = vector.load %arg8[%c2_78, %c0_79, %c0_80] : memref<3x8x36xf32, #tpu.memory_space<vmem>>, vector<1x8x36xf32>
    %131 = vector.shape_cast %130 : vector<1x8x36xf32> to vector<8x36xf32>
    %cst_81 = arith.constant dense<0.000000e+00> : vector<8x288xf32>
    %132 = tpu.matmul %131, %71, %cst_81 {dimension_numbers = #tpu.dot_dimension_numbers<[1], [0], [0], [1], [0, 0, 1, 1], [], []>} : vector<8x36xf32>, vector<36x288xf32>, vector<8x288xf32> -> vector<8x288xf32>
    %133 = arith.addf %129, %132 : vector<8x288xf32>
    %c0_82 = arith.constant 0 : index
    %c3 = arith.constant 3 : index
    %c0_83 = arith.constant 0 : index
    %c0_84 = arith.constant 0 : index
    %134 = vector.load %arg10[%c0_82, %c3, %c0_83, %c0_84] : memref<1x4x8x288xf32, #tpu.memory_space<vmem>>, vector<1x1x8x288xf32>
    %135 = vector.shape_cast %134 : vector<1x1x8x288xf32> to vector<8x288xf32>
    %136 = vector.shape_cast %133 : vector<8x288xf32> to vector<1x1x8x288xf32>
    tpu.vector_store %arg10[%c0_82, %c3, %c0_83, %c0_84], %136 {strides = array<i32>} : memref<1x4x8x288xf32, #tpu.memory_space<vmem>>, vector<1x1x8x288xf32>,
    return
  }
  func.func @transform_0(%arg0: i32, %arg1: i32) -> (i32, i32, i32, i32) {
    %c4_i32 = arith.constant 4 : i32
    %0 = arith.muli %arg1, %c4_i32 : i32
    %c0_i32 = arith.constant 0 : i32
    %1 = arith.addi %0, %c0_i32 : i32
    %c0_i32_0 = arith.constant 0 : i32
    %c0_i32_1 = arith.constant 0 : i32
    %c0_i32_2 = arith.constant 0 : i32
    return %arg0, %1, %c0_i32_0, %c0_i32_1 : i32, i32, i32, i32
  }
  func.func @transform_1(%arg0: i32, %arg1: i32) -> (i32, i32, i32, i32) {
    %c4_i32 = arith.constant 4 : i32
    %0 = arith.muli %arg1, %c4_i32 : i32
    %c1_i32 = arith.constant 1 : i32
    %1 = arith.addi %0, %c1_i32 : i32
    %c0_i32 = arith.constant 0 : i32
    %c0_i32_0 = arith.constant 0 : i32
    %c0_i32_1 = arith.constant 0 : i32
    return %arg0, %1, %c0_i32, %c0_i32_0 : i32, i32, i32, i32
  }
  func.func @transform_2(%arg0: i32, %arg1: i32) -> (i32, i32, i32, i32) {
    %c4_i32 = arith.constant 4 : i32
    %0 = arith.muli %arg1, %c4_i32 : i32
    %c2_i32 = arith.constant 2 : i32
    %1 = arith.addi %0, %c2_i32 : i32
    %c0_i32 = arith.constant 0 : i32
    %c0_i32_0 = arith.constant 0 : i32
    %c0_i32_1 = arith.constant 0 : i32
    return %arg0, %1, %c0_i32, %c0_i32_0 : i32, i32, i32, i32
  }
  func.func @transform_3(%arg0: i32, %arg1: i32) -> (i32, i32, i32, i32) {
    %c4_i32 = arith.constant 4 : i32
    %0 = arith.muli %arg1, %c4_i32 : i32
    %c3_i32 = arith.constant 3 : i32
    %1 = arith.addi %0, %c3_i32 : i32
    %c0_i32 = arith.constant 0 : i32
    %c0_i32_0 = arith.constant 0 : i32
    %c0_i32_1 = arith.constant 0 : i32
    return %arg0, %1, %c0_i32, %c0_i32_0 : i32, i32, i32, i32
  }
  func.func @transform_4(%arg0: i32, %arg1: i32) -> (i32, i32, i32, i32) {
    %c4_i32 = arith.constant 4 : i32
    %0 = arith.muli %arg1, %c4_i32 : i32
    %c4_i32_0 = arith.constant 4 : i32
    %1 = arith.addi %0, %c4_i32_0 : i32
    %c0_i32 = arith.constant 0 : i32
    %c0_i32_1 = arith.constant 0 : i32
    %c0_i32_2 = arith.constant 0 : i32
    return %arg0, %1, %c0_i32, %c0_i32_1 : i32, i32, i32, i32
  }
  func.func @transform_5(%arg0: i32, %arg1: i32) -> (i32, i32, i32, i32) {
    %c4_i32 = arith.constant 4 : i32
    %0 = arith.muli %arg1, %c4_i32 : i32
    %c5_i32 = arith.constant 5 : i32
    %1 = arith.addi %0, %c5_i32 : i32
    %c0_i32 = arith.constant 0 : i32
    %c0_i32_0 = arith.constant 0 : i32
    %c0_i32_1 = arith.constant 0 : i32
    return %arg0, %1, %c0_i32, %c0_i32_0 : i32, i32, i32, i32
  }
  func.func @transform_6(%arg0: i32, %arg1: i32) -> (i32, i32, i32) {
    %c0_i32 = arith.constant 0 : i32
    %c0_i32_0 = arith.constant 0 : i32
    %c0_i32_1 = arith.constant 0 : i32
    %c0_i32_2 = arith.constant 0 : i32
    return %c0_i32, %c0_i32_0, %c0_i32_1 : i32, i32, i32
  }
  func.func @transform_7(%arg0: i32, %arg1: i32) -> (i32, i32) {
    %c0_i32 = arith.constant 0 : i32
    %c0_i32_0 = arith.constant 0 : i32
    %c0_i32_1 = arith.constant 0 : i32
    return %c0_i32, %c0_i32_0 : i32, i32
  }
  func.func @transform_8(%arg0: i32, %arg1: i32) -> (i32, i32, i32, i32) {
    %c0_i32 = arith.constant 0 : i32
    %c0_i32_0 = arith.constant 0 : i32
    %c0_i32_1 = arith.constant 0 : i32
    return %arg0, %arg1, %c0_i32, %c0_i32_0 : i32, i32, i32, i32
  }
}

</mosaic_0001>

<bundles_post_ra>
// kernel: tpu_custom_call.1
= control target key start
LH: loop header
LB: loop body
LE: loop exit
PB: predicated region body
PF: predicated region fallthrough
CT: control target
= control target key end

     0   :  { %s6193_s0 = inlined_call_operand.hbm [shape: f32[2,10,4,342], index: 0, kind: input, shape index: {}]   ;;  %s6194_s1 = inlined_call_operand.hbm [shape: f32[2,10,4,342], index: 1, kind: input, shape index: {}]   ;;  %s6195_s2 = inlined_call_operand.hbm [shape: f32[2,10,4,342], index: 2, kind: input, shape index: {}]   ;;  %s6196_s3 = inlined_call_operand.hbm [shape: f32[2,10,4,342], index: 3, kind: input, shape index: {}]   ;;  %s6197_s4 = inlined_call_operand.hbm [shape: f32[2,10,4,342], index: 4, kind: input, shape index: {}]   ;;  %s6198_s5 = inlined_call_operand.hbm [shape: f32[2,10,4,342], index: 5, kind: input, shape index: {}]   ;;  %s6199_s6 = inlined_call_operand.hbm [shape: f32[3,8,36], index: 6, kind: input, shape index: {}]   ;;  %s6200_s7 = inlined_call_operand.vmem [shape: f32[8,1], index: 7, kind: input, shape index: {}]   ;;  %s6201_s8 = inlined_call_operand.hbm [shape: f32[2,8,8,288], index: 8, kind: output, shape index: {}]  }
   0x1   :  { %6234 = sst [smem:[#allocation51_spill]] %s6193_s0 }
   0x2   :  { %6235 = sst [smem:[#allocation52_spill]] %s6194_s1 }
   0x3   :  { %6236 = sst [smem:[#allocation53_spill]] %s6195_s2 }
   0x4   :  { %6237 = sst [smem:[#allocation54_spill]] %s6196_s3 }
   0x5   :  { %6238 = sst [smem:[#allocation55_spill]] %s6197_s4 }
   0x6   :  { %6239 = sst [smem:[#allocation56_spill]] %s6198_s5 }
   0x7   :  { %6240 = sst [smem:[#allocation57_spill]] %s6199_s6 }
   0x8   :  { %6241 = sst [smem:[#allocation58_spill]] %s6200_s7 }
   0x9   :  { %6242 = sst [smem:[#allocation59_spill]] %s6201_s8 }
   0xa   :  { %13 = vsyncpa [#allocation3], 0 }
   0xb   :  { %15 = vsyncpa [#allocation3 + $0x1], 0 }
   0xc   :  { %16 = vsyncpa [#allocation6], 0 }
   0xd   :  { %18 = vsyncpa [#allocation6 + $0x1], 0 }
   0xe   :  { %19 = vsyncpa [#allocation9], 0 }
   0xf   :  { %21 = vsyncpa [#allocation9 + $0x1], 0 }
  0x10   :  { %22 = vsyncpa [#allocation12], 0 }
  0x11   :  { %24 = vsyncpa [#allocation12 + $0x1], 0 }
  0x12   :  { %25 = vsyncpa [#allocation4], 0 }
  0x13   :  { %27 = vsyncpa [#allocation4 + $0x1], 0  ;;  %s4510_s27 = smov 0   ;;  %s4512_s28 = smov 0  }
  0x14   :  { %s4514_s29 = smov 0   ;;  %s4516_s30 = smov 0  }
  0x15   :  { %s4518_s9 = smov 0   ;;  %s4520_s10 = smov 0  }
  0x16   :  { %s4522_s11 = smov 0   ;;  %s4524_s12 = smov 0  }
  0x17   :  { %s4526_s13 = smov 0   ;;  %s4528_s14 = smov 0  }
  0x18   :  { %s4530_s15 = smov 0   ;;  %s4532_s16 = smov 0  }
  0x19   :  { %s4534_s17 = smov 0   ;;  %s4536_s18 = smov 0  }
  0x1a   :  { %s4538_s19 = smov 0   ;;  %s4540_s20 = smov 0  }
  0x1b   :  { %s4542_s21 = smov 0   ;;  %s4544_s22 = smov 0  }
  0x1c   :  { %s4546_s23 = smov 0   ;;  %s4548_s24 = smov 0  }
  0x1d   :  { %s4550_s25 = smov 0   ;;  %s4552_s26 = smov 0  }
  0x1e   :  { %s4554_s8 = smov 0   ;;  %s4556_s7 = smov 0  }
  0x1f   :  { %s4558_s5 = smov 0   ;;  %s4560_s4 = smov 0  }
  0x20 LB: > { %6243 = sst [smem:[#allocation23_spill]] %s4340_s27  ;;  %p3343_p0 = scmp.ge.s32.totalorder %s4440_s4, 1  ;;  %s4440_s4 = sphi %s4560_s4, %s33_s4   ;;  %s4436_s5 = sphi %s4558_s5, %s6375_s5   ;;  %s4432_s7 = sphi %s4556_s7, %s6374_s7   ;;  %s4428_s8 = sphi %s4554_s8, %s6359_s8   ;;  %s4424_s26 = sphi %s4552_s26, %s6373_s26   ;;  %s4420_s25 = sphi %s4550_s25, %s6372_s25   ;;  %s4416_s24 = sphi %s4548_s24, %s6371_s24   ;;  %s4412_s23 = sphi %s4546_s23, %s6370_s23   ;;  %s4408_s22 = sphi %s4544_s22, %s6369_s22   ;;  %s4404_s21 = sphi %s4542_s21, %s6353_s21   ;;  %s4400_s20 = sphi %s4540_s20, %s6352_s20   ;;  %s4396_s19 = sphi %s4538_s19, %s6368_s19   ;;  %s4392_s18 = sphi %s4536_s18, %s6367_s18   ;;  %s4388_s17 = sphi %s4534_s17, %s6366_s17   ;;  %s4384_s16 = sphi %s4532_s16, %s6365_s16   ;;  %s4380_s15 = sphi %s4530_s15, %s6364_s15   ;;  %s4376_s14 = sphi %s4528_s14, %s6363_s14   ;;  %s4372_s13 = sphi %s4526_s13, %s6383_s13   ;;  %s4368_s12 = sphi %s4524_s12, %s6360_s12   ;;  %s4364_s11 = sphi %s4522_s11, %s6347_s11   ;;  %s4360_s10 = sphi %s4520_s10, %s6357_s10   ;;  %s4356_s9 = sphi %s4518_s9, %s6346_s9   ;;  %s4352_s30 = sphi %s4516_s30, %s6345_s30   ;;  %s4348_s29 = sphi %s4514_s29, %s6344_s29   ;;  %s4344_s28 = sphi %s4512_s28, %s6343_s28   ;;  %s4340_s27 = sphi %s4510_s27, %s6342_s27  }
  0x21   : > { %6244 = sst [smem:[#allocation24_spill]] %s4344_s28  ;;  %p310_p3 = scmp.lt.s32.totalorder %s4440_s4, 5 }
  0x22   : > { %6245 = sst [smem:[#allocation25_spill]] %s4348_s29 }
  0x23   : > { %6246 = sst [smem:[#allocation26_spill]] %s4352_s30  ;;  %s4641_s30 = sadd.s32 4294967295, %s4440_s4  }
  0x24   : > { %6247 = sst [smem:[#allocation27_spill]] %s4356_s9  ;;  %p6224_p1 = scmp.eq.s32.totalorder %s4641_s30, 0 }
  0x25   : > { %6248 = sst [smem:[#allocation28_spill]] %s4360_s10  ;;  %p297_p2 = scmp.eq.s32.totalorder %s4641_s30, 3 }
  0x26   : > { %6249 = sst [smem:[#allocation29_spill]] %s4364_s11  ;;  %p4647_p4 = pnand %p3343_p0, %p310_p3 }
  0x27   : > { %6250 = sst [smem:[#allocation30_spill]] %s4368_s12 }
  0x28   : > { %6251 = sst [smem:[#allocation31_spill]] %s4372_s13  ;;  %p3703_p5 = pneg %p4647_p4 }
  0x29   : > { %6252 = sst [smem:[#allocation32_spill]] %s4388_s17 }
  0x2a   : > { %6253 = sst [smem:[#allocation33_spill]] %s4392_s18  ;;  %p3704_p6 = pnand %p3703_p5, %p6224_p1 }
  0x2b   : > { %6254 = sst [smem:[#allocation34_spill]] %s4404_s21 }
  0x2c   : > { %6255 = sst [smem:[#allocation35_spill]] %s4408_s22  ;;  %p3979_p7 = pneg %p3704_p6 }
  0x2d   : > { %6256 = sst [smem:[#allocation36_spill]] %s4420_s25 }
  0x2e   : > { %6257 = sst [smem:[#allocation37_spill]] %s4424_s26  ;;  %s4442_s26 = smov [#allocation13]  }
  0x2f   : > { %6258 = sst [smem:[#allocation38_spill]] %s4428_s8  ;;  %s322_s9 = sshll.u32 %s4442_s26, 4  ;;  %s323_s9 = int_to_ptr.vmem [resolvable:$true] %s322_s9 }
  0x30   : > { %6259 = sst [smem:[#allocation39_spill]] %s4432_s7  ;;  %s3988_s10 = scalar_lea.vmem %s323_s9, 384 }
  0x31   : > { %6260 = sst [smem:[#allocation40_spill]] %s4436_s5  ;;  %p3989_p8 = scmp.ne.s32.totalorder %s323_s9, %s3988_s10 }
  0x32   : > { %s6261_s8 = scalar_select %p4647_p4, 1, 0 }
  0x33   : > { %p3991_p9 = pnand %p3989_p8, %p3979_p7  ;;  %p3996_p11 = scmp.lt.s32.totalorder %s323_s9, %s323_s9 }
  0x34   : > { %6262 = sst [smem:[#allocation41_spill]] %s6261_s8  ;;  %p3997_p12 = scmp.lt.s32.totalorder %s3988_s10, %s3988_s10 }
  0x35   : > { %p3992_p10 = pneg %p3991_p9 }
  0x36   : > { %p3998_p13 = por %p3997_p12, %p3996_p11 }
  0x38   : > { %p3999_p0 = pnand %p3998_p13, %p3992_p10 }
  0x3a   : > { %4002 = shalt.err (!%p3999_p0)
}
  0x3b   : > { %s4443_s11 = smov 128   ;;  %s4444_s26 = smov 8  }
  0x3c   : > { %s6263_s6 = sld [smem:[#allocation57_spill]]  ;;  %s42_s10 = sadd.s32 1, %s4432_s7 }
  0x3d   : > { %p43_p3 = scmp.ge.s32.totalorder %s42_s10, 2  ;;  %s45_s2 = sadd.s32 1, %s4436_s5 }
  0x3e   : > { %s4662_s17 = sshll.u32 %s4432_s7, 2  ;;  %p6225_p5 = scmp.eq.s32.totalorder %s4440_s4, 0 }
  0x3f   : > { %s6377_s10 = smov (%p43_p3, %s42_s10), 0  ;;  %s6379_s2 = smov (!%p43_p3, %s45_s2), %s4436_s5 }
  0x40   : > { %6264 = sst [smem:[#allocation42_spill]] %s6377_s10  ;;  %s6265_s18 = smov %s6377_s10 }
  0x41   : > { %s4669_s8 = sshll.u32 %s6265_s18, 2  ;;  %p95_p7 = scmp.ne.s32.totalorder %s4408_s22, %s4404_s21 }
  0x42   : > { %3706 = dma.hbm_to_vmem [thread:$0]  (!%p3704_p6), %s6263_s6, 384, %s323_s9, [#allocation12], %s4443_s11, %s4443_s11, %s4444_s26  }
  0x43   : > { %s80_s9 = sadd.s32 1, %s4662_s17  ;;  %p47_p6 = scmp.ge.s32.totalorder %s6379_s2, 2 }
  0x44   : > { %s82_s11 = sadd.s32 1, %s4669_s8  ;;  %s88_s26 = sadd.s32 1, %s4408_s22 }
  0x45   : > { %s84_s12 = ssub.s32 %s80_s9, %s82_s11  ;;  %s6381_s2 = smov (%p47_p6, %s6379_s2), 0 }
  0x46   : > { %6266 = sst [smem:[#allocation43_spill]] %s6381_s2  ;;  %p101_p8 = scmp.ne.s32.totalorder %s4404_s21, %s4400_s20 }
  0x47   : > { %s4682_s10 = ssub.s32 %s4436_s5, %s6381_s2  ;;  %s282_s13 = ssub.s32 %s4432_s7, %s6265_s18 }
  0x48   : > { %s85_s6 = sor.u32 %s84_s12, %s4682_s10  ;;  %p4689_p9 = por %p95_p7, %p6225_p5 }
  0x49   : > { %p86_p10 = scmp.eq.s32.totalorder %s85_s6, 0  ;;  %p4695_p11 = por %p101_p8, %p6224_p1 }
  0x4a   : > { %s283_s11 = sor.u32 %s282_s13, %s4682_s10  ;;  %s286_s2 = sadd.s32 1, %s4348_s29 }
  0x4b   : > { %s6268_s20 = scalar_select %p4695_p11, 1, 0 }
  0x4c   : > { %s4702_s21 = scalar_select %p86_p10, %s4408_s22, %s88_s26  }
  0x4d   : > { %6269 = sst [smem:[#allocation44_spill]] %s6268_s20  ;;  %p284_p12 = scmp.eq.s32.totalorder %s283_s11, 0 }
  0x4e   : > { %6270 = sst [smem:[#allocation45_spill]] %s4702_s21  ;;  %p296_p13 = scmp.ne.s32.totalorder %s4348_s29, %s4344_s28 }
  0x4f   : > { %p302_p0 = scmp.ne.s32.totalorder %s4344_s28, %s4340_s27  ;;  %s6271_s12 = sadd.s32 4294967294, %s4440_s4  }
  0x50   : > { %p303_p3 = scmp.eq.s32.totalorder %s6271_s12, 3  ;;  %p4715_p6 = por %p297_p2, %p296_p13 }
  0x51   : > { %s4711_s18 = scalar_select %p284_p12, %s4348_s29, %s286_s2  }
  0x52   : > { %s6273_s6 = scalar_select %p4715_p6, 1, 0 }
  0x53   : > { %6272 = sst [smem:[#allocation46_spill]] %s4711_s18  ;;  %p4719_p7 = por %p303_p3, %p302_p0 }
  0x54   : > { %6274 = sst [smem:[#allocation47_spill]] %s6273_s6  ;;  %p6223_p8 = scmp.lt.s32.totalorder %s4440_s4, 4 }
  0x55   : > { %s6275_s20 = scalar_select %p4719_p7, 1, 0 }
  0x56   : > { %s3669_s13 = smul.u32 12, %s4432_s7  ;;  %s4727_s21 = sand.u32 1, %s4440_s4  }
  0x57   : > { %6276 = sst [smem:[#allocation48_spill]] %s6275_s20  ;;  %s3670_s26 = smul.u32 30, %s4436_s5 }
  0x58   : > { %s363_s11 = sand.u32 1, %s4408_s22   ;;  %p4736_p2 = pnand %p6223_p8, %p4689_p9 }
  0x59   : > { %s350_s27 = sadd.s32 %s3670_s26, %s3669_s13  ;;  %s3671_s12 = smul.u32 12, %s363_s11 }
  0x5a   : > { %s4730_s2 = sshll.u32 %s350_s27, 6  ;;  %s6278_s1 = sld [smem:[#allocation52_spill]] }
  0x5b   : > { %s365_s6 = scalar_lea.vmem [#allocation5], %s3671_s12  ;;  %s6226_s13 = scalar_lea.sflag [#allocation6], %s4727_s21 }
  0x5c   : > { %s377_s28 = sshll.u32 %s365_s6, 4  ;;  %p4005_p10 = pneg %p4736_p2  ;;  %s378_s28 = int_to_ptr.vmem [resolvable:$true] %s377_s28 }
  0x5d   : > { %s4016_s27 = scalar_lea.vmem %s378_s28, 192  ;;  %s4445_s9 = smov [#allocation5]  }
  0x5e   : > { %p4017_p12 = scmp.ne.s32.totalorder %s378_s28, %s4016_s27  ;;  %s4021_s26 = sshll.u32 %s4445_s9, 4  ;;  %s4022_s26 = int_to_ptr.vmem [resolvable:$false] %s4021_s26 }
  0x5f   : > { %s4023_s11 = scalar_lea.vmem %s4022_s26, 384  ;;  %p4024_p9 = scmp.lt.s32.totalorder %s378_s28, %s4022_s26 }
  0x60   : > { %s3148_s5 = scalar_lea.hbm %s6278_s1, %s4730_s2  ;;  %p4019_p13 = pnand %p4017_p12, %p4005_p10 }
  0x61   : > { %s3149_s7 = scalar_lea.hbm %s3148_s5, 192  ;;  %p4025_p3 = scmp.lt.s32.totalorder %s4023_s11, %s4016_s27 }
  0x62   : > { %p4020_p0 = pneg %p4019_p13 }
  0x63   : > { %p4026_p8 = por %p4025_p3, %p4024_p9 }
  0x65   : > { %p4027_p1 = pnand %p4026_p8, %p4020_p0 }
  0x67   : > { %4030 = shalt.err (!%p4027_p1)
}
  0x68   : > { %3713 = dma.hbm_to_vmem [thread:$0]  (!%p4736_p2), %s3149_s7, 192, %s378_s28, %s6226_s13  }
  0x69   : > { %s144_s5 = sadd.s32 3, %s4662_s17  ;;  %s146_s29 = sadd.s32 3, %s4669_s8 }
  0x6a   : > { %s148_s18 = ssub.s32 %s144_s5, %s146_s29  ;;  %s152_s20 = sadd.s32 1, %s4384_s16 }
  0x6b   : > { %s149_s6 = sor.u32 %s148_s18, %s4682_s10  ;;  %p159_p1 = scmp.ne.s32.totalorder %s4384_s16, %s4380_s15 }
  0x6c   : > { %p150_p8 = scmp.eq.s32.totalorder %s149_s6, 0  ;;  %p165_p10 = scmp.ne.s32.totalorder %s4380_s15, %s4376_s14 }
  0x6d   : > { %p161_p12 = por %p159_p1, %p6225_p5  ;;  %p6279_p13 = scmp.eq.s32.totalorder %s4641_s30, 0 }
  0x6e   : > { %s4762_s12 = scalar_select %p150_p8, %s4384_s16, %s152_s20  }
  0x6f   : > { %p4766_p0 = por %p165_p10, %p6279_p13  ;;  %s409_s7 = sand.u32 1, %s4384_s16  }
  0x70   : > { %s3673_s28 = smul.u32 12, %s409_s7  ;;  %s6281_s3 = sld [smem:[#allocation54_spill]] }
  0x71   : > { %p6282_p2 = scmp.lt.s32.totalorder %s4440_s4, 4  ;;  %s6227_s20 = scalar_lea.sflag [#allocation9], %s4727_s21 }
  0x72   : > { %s411_s14 = scalar_lea.vmem [#allocation8], %s3673_s28  ;;  %s4446_s7 = smov [#allocation8]  }
  0x73   : > { %p4777_p9 = pnand %p6282_p2, %p161_p12  ;;  %s423_s18 = sshll.u32 %s411_s14, 4  ;;  %s424_s18 = int_to_ptr.vmem [resolvable:$true] %s423_s18 }
  0x74   : > { %s4045_s6 = scalar_lea.vmem %s424_s18, 192  ;;  %s4050_s9 = sshll.u32 %s4446_s7, 4  ;;  %s4051_s9 = int_to_ptr.vmem [resolvable:$false] %s4050_s9 }
  0x75   : > { %p4034_p3 = pneg %p4777_p9  ;;  %p4046_p1 = scmp.ne.s32.totalorder %s424_s18, %s4045_s6 }
  0x76   : > { %s3168_s11 = scalar_lea.hbm %s6281_s3, %s4730_s2  ;;  %s4052_s26 = scalar_lea.vmem %s4051_s9, 384 }
  0x77   : > { %s3169_s5 = scalar_lea.hbm %s3168_s11, 576  ;;  %p4048_p8 = pnand %p4046_p1, %p4034_p3 }
  0x78   : > { %p4053_p13 = scmp.lt.s32.totalorder %s424_s18, %s4051_s9  ;;  %p4054_p12 = scmp.lt.s32.totalorder %s4052_s26, %s4045_s6 }
  0x79   : > { %p4049_p10 = pneg %p4048_p8 }
  0x7a   : > { %p4055_p2 = por %p4054_p12, %p4053_p13 }
  0x7c   : > { %p4056_p5 = pnand %p4055_p2, %p4049_p10 }
  0x7e   : > { %4059 = shalt.err (!%p4056_p5)
}
  0x7f   : > { %3719 = dma.hbm_to_vmem [thread:$0]  (!%p4777_p9), %s3169_s5, 192, %s424_s18, %s6227_s20  }
  0x80   : > { %s52_s28 = ssub.s32 %s4662_s17, %s4669_s8  ;;  %s56_s11 = sadd.s32 1, %s4420_s25 }
  0x81   : > { %s53_s29 = sor.u32 %s52_s28, %s4682_s10  ;;  %p63_p5 = scmp.ne.s32.totalorder %s4420_s25, %s4416_s24 }
  0x82   : > { %p54_p3 = scmp.eq.s32.totalorder %s53_s29, 0  ;;  %p69_p1 = scmp.ne.s32.totalorder %s4416_s24, %s4412_s23 }
  0x83   : > { %p6284_p8 = scmp.eq.s32.totalorder %s4440_s4, 0  ;;  %s339_s14 = sand.u32 1, %s4420_s25  }
  0x84   : > { %s4800_s6 = scalar_select %p54_p3, %s4420_s25, %s56_s11  }
  0x85   : > { %p65_p10 = por %p6284_p8, %p63_p5  ;;  %p6286_p13 = scmp.eq.s32.totalorder %s4641_s30, 0 }
  0x86   : > { %6285 = sst [smem:[#allocation49_spill]] %s4800_s6  ;;  %s3668_s9 = smul.u32 12, %s339_s14 }
  0x87   : > { %p4804_p12 = por %p6286_p13, %p69_p1  ;;  %s6288_s0 = sld [smem:[#allocation51_spill]] }
  0x88   : > { %p6289_p9 = scmp.lt.s32.totalorder %s4440_s4, 4  ;;  %s343_s23 = scalar_lea.vmem [#allocation2], %s3668_s9 }
  0x89   : > { %s354_s28 = sshll.u32 %s343_s23, 4  ;;  %s340_s11 = scalar_lea.sflag [#allocation3], %s339_s14  ;;  %s355_s28 = int_to_ptr.vmem [resolvable:$true] %s354_s28 }
  0x8a   : > { %p4814_p2 = pnand %p6289_p9, %p65_p10  ;;  %s4074_s29 = scalar_lea.vmem %s355_s28, 192 }
  0x8b   : > { %p4075_p3 = scmp.ne.s32.totalorder %s355_s28, %s4074_s29  ;;  %s4447_s20 = smov [#allocation2]  }
  0x8c   : > { %p4063_p5 = pneg %p4814_p2  ;;  %s4079_s1 = sshll.u32 %s4447_s20, 4  ;;  %s4080_s1 = int_to_ptr.vmem [resolvable:$false] %s4079_s1 }
  0x8d   : > { %s352_s5 = scalar_lea.hbm %s6288_s0, %s4730_s2  ;;  %s4081_s13 = scalar_lea.vmem %s4080_s1, 384 }
  0x8e   : > { %p4077_p1 = pnand %p4075_p3, %p4063_p5  ;;  %p4082_p13 = scmp.lt.s32.totalorder %s355_s28, %s4080_s1 }
  0x8f   : > { %p4083_p10 = scmp.lt.s32.totalorder %s4081_s13, %s4074_s29 }
  0x90   : > { %p4078_p8 = pneg %p4077_p1 }
  0x91   : > { %p4084_p9 = por %p4083_p10, %p4082_p13 }
  0x93   : > { %p4085_p7 = pnand %p4084_p9, %p4078_p8 }
  0x95   : > { %4088 = shalt.err (!%p4085_p7)
}
  0x96   : > { %s6291_s14 = sld [smem:[#allocation33_spill]]  ;;  %s112_s1 = sadd.s32 2, %s4662_s17 }
  0x97   : > { %s6292_s9 = sld [smem:[#allocation32_spill]]  ;;  %s114_s20 = sadd.s32 2, %s4669_s8 }
  0x98   : > { %3710 = dma.hbm_to_vmem [thread:$0]  (!%p4814_p2), %s352_s5, 192, %s355_s28, %s340_s11  }
  0x99   : > { %s120_s26 = sadd.s32 1, %s4396_s19  ;;  %s116_s23 = ssub.s32 %s112_s1, %s114_s20 }
  0x9a   : > { %s117_s18 = sor.u32 %s116_s23, %s4682_s10  ;;  %p6293_p1 = scmp.eq.s32.totalorder %s4440_s4, 0 }
  0x9b   : > { %p118_p3 = scmp.eq.s32.totalorder %s117_s18, 0  ;;  %p6294_p13 = scmp.eq.s32.totalorder %s4641_s30, 0 }
  0x9c   : > { %p127_p7 = scmp.ne.s32.totalorder %s4396_s19, %s6291_s14  ;;  %s386_s13 = sand.u32 1, %s4396_s19  }
  0x9d   : > { %p133_p5 = scmp.ne.s32.totalorder %s6291_s14, %s6292_s9  ;;  %s3672_s5 = smul.u32 12, %s386_s13 }
  0x9e   : > { %p129_p8 = por %p127_p7, %p6293_p1  ;;  %s6297_s3 = sld [smem:[#allocation53_spill]] }
  0x9f   : > { %p4834_p10 = por %p133_p5, %p6294_p13  ;;  %p6298_p2 = scmp.lt.s32.totalorder %s4440_s4, 4 }
  0xa0   : > { %s4840_s0 = scalar_select %p118_p3, %s4396_s19, %s120_s26  }
  0xa1   : > { %p4848_p9 = pnand %p6298_p2, %p129_p8  ;;  %s388_s9 = scalar_lea.vmem [#allocation7], %s3672_s5 }
  0xa2   : > { %6296 = sst [smem:[#allocation50_spill]] %s4840_s0  ;;  %s400_s20 = sshll.u32 %s388_s9, 4  ;;  %s401_s20 = int_to_ptr.vmem [resolvable:$true] %s400_s20 }
  0xa3   : > { %p4091_p7 = pneg %p4848_p9  ;;  %s4102_s23 = scalar_lea.vmem %s401_s20, 192 }
  0xa4   : > { %s3158_s6 = scalar_lea.hbm %s6297_s3, %s4730_s2  ;;  %p4103_p5 = scmp.ne.s32.totalorder %s401_s20, %s4102_s23 }
  0xa5   : > { %s3159_s1 = scalar_lea.hbm %s3158_s6, 384  ;;  %s4448_s26 = smov [#allocation7]  }
  0xa6   : > { %p4105_p3 = pnand %p4103_p5, %p4091_p7  ;;  %s4107_s18 = sshll.u32 %s4448_s26, 4  ;;  %s4108_s18 = int_to_ptr.vmem [resolvable:$false] %s4107_s18 }
  0xa7   : > { %s4109_s3 = scalar_lea.vmem %s4108_s18, 384  ;;  %p4110_p13 = scmp.lt.s32.totalorder %s401_s20, %s4108_s18 }
  0xa8   : > { %p4106_p1 = pneg %p4105_p3  ;;  %p4111_p6 = scmp.lt.s32.totalorder %s4109_s3, %s4102_s23 }
  0xaa   : > { %p4112_p8 = por %p4111_p6, %p4110_p13 }
  0xac   : > { %p4113_p2 = pnand %p4112_p8, %p4106_p1 }
  0xae   : > { %4116 = shalt.err (!%p4113_p2)
}
  0xaf   : > { %s6300_s6 = scalar_lea.sflag [#allocation6], %s4727_s21  ;;  %s6301_s13 = sld [smem:[#allocation31_spill]] }
  0xb0   : > { %s6302_s5 = sld [smem:[#allocation30_spill]]  ;;  %s176_s11 = sadd.s32 4, %s4662_s17 }
  0xb1   : > { %s6303_s28 = sld [smem:[#allocation29_spill]]  ;;  %s178_s9 = sadd.s32 4, %s4669_s8 }
  0xb2   : > { %3716 = dma.hbm_to_vmem [thread:$0]  (!%p4848_p9), %s3159_s1, 192, %s401_s20, %s6300_s6  }
  0xb3   : > { %s180_s14 = ssub.s32 %s176_s11, %s178_s9  ;;  %p6304_p3 = scmp.eq.s32.totalorder %s4440_s4, 0 }
  0xb4   : > { %s181_s26 = sor.u32 %s180_s14, %s4682_s10  ;;  %p6305_p13 = scmp.eq.s32.totalorder %s4641_s30, 0 }
  0xb5   : > { %s184_s23 = sadd.s32 1, %s6301_s13  ;;  %p182_p7 = scmp.eq.s32.totalorder %s181_s26, 0 }
  0xb6   : > { %p191_p6 = scmp.ne.s32.totalorder %s6301_s13, %s6302_s5  ;;  %s432_s18 = sand.u32 1, %s6301_s13  }
  0xb7   : > { %p197_p5 = scmp.ne.s32.totalorder %s6302_s5, %s6303_s28  ;;  %s6383_s13 = smov (!%p182_p7, %s6301_s13), %s184_s23 }
  0xb8   : > { %p193_p1 = por %p191_p6, %p6304_p3  ;;  %s3674_s25 = smul.u32 12, %s432_s18 }
  0xb9   : > { %p4874_p8 = por %p197_p5, %p6305_p13  ;;  %s6307_s6 = sld [smem:[#allocation55_spill]] }
  0xba   : > { %p6308_p9 = scmp.lt.s32.totalorder %s4440_s4, 4  ;;  %s434_s28 = scalar_lea.vmem [#allocation10], %s3674_s25 }
  0xbb   : > { %s6306_s3 = scalar_select %p4874_p8, 1, 0 }
  0xbc   : > { %p4884_p2 = pnand %p6308_p9, %p193_p1  ;;  %s446_s14 = sshll.u32 %s434_s28, 4  ;;  %s447_s14 = int_to_ptr.vmem [resolvable:$true] %s446_s14 }
  0xbd   : > { %s4131_s23 = scalar_lea.vmem %s447_s14, 192  ;;  %s4449_s26 = smov [#allocation10]  }
  0xbe   : > { %p4120_p6 = pneg %p4884_p2  ;;  %p4132_p7 = scmp.ne.s32.totalorder %s447_s14, %s4131_s23 }
  0xbf   : > { %s3178_s11 = scalar_lea.hbm %s6307_s6, %s4730_s2  ;;  %s4136_s18 = sshll.u32 %s4449_s26, 4  ;;  %s4137_s18 = int_to_ptr.vmem [resolvable:$false] %s4136_s18 }
  0xc0   : > { %s3179_s5 = scalar_lea.hbm %s3178_s11, 768  ;;  %p4134_p5 = pnand %p4132_p7, %p4120_p6 }
  0xc1   : > { %s4138_s1 = scalar_lea.vmem %s4137_s18, 384  ;;  %p4139_p13 = scmp.lt.s32.totalorder %s447_s14, %s4137_s18 }
  0xc2   : > { %p4135_p3 = pneg %p4134_p5  ;;  %p4140_p1 = scmp.lt.s32.totalorder %s4138_s1, %s4131_s23 }
  0xc4   : > { %p4141_p9 = por %p4140_p1, %p4139_p13 }
  0xc6   : > { %p4142_p8 = pnand %p4141_p9, %p4135_p3 }
  0xc8   : > { %4145 = shalt.err (!%p4142_p8)
}
  0xc9   : > { %s6310_s25 = scalar_lea.sflag [#allocation9], %s4727_s21  ;;  %s6311_s20 = sld [smem:[#allocation28_spill]] }
  0xca   : > { %s6312_s6 = sld [smem:[#allocation27_spill]]  ;;  %s208_s28 = sadd.s32 5, %s4662_s17 }
  0xcb   : > { %s6313_s11 = sld [smem:[#allocation26_spill]]  ;;  %s210_s23 = sadd.s32 5, %s4669_s8 }
  0xcc   : > { %3722 = dma.hbm_to_vmem [thread:$0]  (!%p4884_p2), %s3179_s5, 192, %s447_s14, %s6310_s25  }
  0xcd   : > { %s212_s26 = ssub.s32 %s208_s28, %s210_s23  ;;  %p6314_p5 = scmp.eq.s32.totalorder %s4440_s4, 0 }
  0xce   : > { %s213_s18 = sor.u32 %s212_s26, %s4682_s10  ;;  %p6315_p13 = scmp.eq.s32.totalorder %s4641_s30, 0 }
  0xcf   : > { %s216_s9 = sadd.s32 1, %s6311_s20  ;;  %p214_p7 = scmp.eq.s32.totalorder %s213_s18, 0 }
  0xd0   : > { %p223_p8 = scmp.ne.s32.totalorder %s6311_s20, %s6312_s6  ;;  %s455_s0 = sand.u32 1, %s6311_s20  }
  0xd1   : > { %p229_p6 = scmp.ne.s32.totalorder %s6312_s6, %s6313_s11  ;;  %s6317_s8 = sld [smem:[#allocation56_spill]] }
  0xd2   : > { %p225_p3 = por %p223_p8, %p6314_p5  ;;  %s3675_s25 = smul.u32 12, %s455_s0 }
  0xd3   : > { %p4906_p1 = por %p229_p6, %p6315_p13  ;;  %p6318_p2 = scmp.lt.s32.totalorder %s4440_s4, 4 }
  0xd4   : > { %s4911_s22 = scalar_select %p214_p7, %s6311_s20, %s216_s9  }
  0xd5   : > { %s6316_s1 = scalar_select %p4906_p1, 1, 0 }
  0xd6   : > { %p4920_p9 = pnand %p6318_p2, %p225_p3  ;;  %s457_s11 = scalar_lea.vmem [#allocation11], %s3675_s25 }
  0xd7   : > { %s3188_s14 = scalar_lea.hbm %s6317_s8, %s4730_s2  ;;  %s469_s28 = sshll.u32 %s457_s11, 4  ;;  %s470_s28 = int_to_ptr.vmem [resolvable:$true] %s469_s28 }
  0xd8   : > { %s3189_s6 = scalar_lea.hbm %s3188_s14, 960  ;;  %s454_s23 = scalar_lea.sflag [#allocation12], %s4727_s21 }
  0xd9   : > { %p4149_p8 = pneg %p4920_p9  ;;  %s4160_s9 = scalar_lea.vmem %s470_s28, 192 }
  0xda   : > { %p4161_p6 = scmp.ne.s32.totalorder %s470_s28, %s4160_s9  ;;  %s4450_s20 = smov [#allocation11]  }
  0xdb   : > { %s4165_s2 = sshll.u32 %s4450_s20, 4  ;;  %s4166_s2 = int_to_ptr.vmem [resolvable:$false] %s4165_s2 }
  0xdc   : > { %p4163_p7 = pnand %p4161_p6, %p4149_p8  ;;  %s4167_s0 = scalar_lea.vmem %s4166_s2, 384 }
  0xdd   : > { %p4168_p3 = scmp.lt.s32.totalorder %s470_s28, %s4166_s2  ;;  %p4169_p13 = scmp.lt.s32.totalorder %s4167_s0, %s4160_s9 }
  0xde   : > { %p4164_p5 = pneg %p4163_p7 }
  0xdf   : > { %p4170_p2 = por %p4169_p13, %p4168_p3 }
  0xe1   : > { %p4171_p1 = pnand %p4170_p2, %p4164_p5 }
  0xe3   : > { %4174 = shalt.err (!%p4171_p1)
}
  0xe4   : > { %3725 = dma.hbm_to_vmem [thread:$0]  (!%p4920_p9), %s3189_s6, 192, %s470_s28, %s454_s23  }
  0xe5   : > { %478 = sbr.rel (%p4647_p4) target bundleno = 914 (0x392), region = 52  ;;  %s480_s21 = sand.u32 (!%p4647_p4), 1, %s4416_s24  }
  0xe6   : > { %s4932_s18 = smul.u32 (!%p4647_p4), 12, %s480_s21  ;;  %s481_s5 = scalar_lea.sflag (!%p4647_p4), [#allocation3], %s480_s21 }
  0xe8   : > { %s484_s17 = scalar_lea.vmem (!%p4647_p4), [#allocation2], %s4932_s18 }
  0xea   : > { %4307 = dma.done.wait (%p4804_p12), %s481_s5, 192  }
  0xeb   : > { %4309 = vsyncadd (%p4804_p12), %s481_s5, 4294967104  ;;  %s6321_s8 = sld [smem:[#allocation34_spill]]  ;;  %s489_s25 = sand.u32 1, %s4641_s30  }
  0xec   : > { %s490_s11 = scalar_lea.sflag [#allocation6], %s489_s25 }
  0xf1   : > { %s491_s10 = sand.u32 1, %s6321_s8  }
  0xf2   : > { %s4941_s6 = smul.u32 12, %s491_s10 }
  0xf4   : > { %s493_s28 = scalar_lea.vmem [#allocation5], %s4941_s6 }
  0xf5   : > { %4311 = dma.done.wait (%p4695_p11), %s490_s11, 192  }
  0xf6   : > { %4313 = vsyncadd (%p4695_p11), %s490_s11, 4294967104  ;;  %s6323_s23 = sld [smem:[#allocation33_spill]] }
  0xfc   : > { %s500_s9 = sand.u32 1, %s6323_s23  }
  0xfd   : > { %s4949_s7 = smul.u32 12, %s500_s9 }
  0xff   : > { %s502_s20 = scalar_lea.vmem [#allocation7], %s4949_s7 }
 0x100   : > { %4315 = dma.done.wait (%p4834_p10), %s490_s11, 192  }
 0x101   : > { %4317 = vsyncadd (%p4834_p10), %s490_s11, 4294967104  ;;  %s509_s2 = sand.u32 1, %s4380_s15   ;;  %s508_s26 = scalar_lea.sflag [#allocation9], %s489_s25 }
 0x102   : > { %s4957_s0 = smul.u32 12, %s509_s2 }
 0x104   : > { %s511_s21 = scalar_lea.vmem [#allocation8], %s4957_s0 }
 0x105   : > { %4319 = dma.done.wait (%p4766_p0), %s508_s26, 192  }
 0x106   : > { %4321 = vsyncadd (%p4766_p0), %s508_s26, 4294967104  ;;  %s6324_s5 = sld [smem:[#allocation30_spill]]  ;;  %p6325_p4 = scmp.ne.s32.totalorder %s6306_s3, 0 }
 0x10c   : > { %s518_s8 = sand.u32 1, %s6324_s5  }
 0x10d   : > { %s4965_s14 = smul.u32 12, %s518_s8 }
 0x10f   : > { %s520_s29 = scalar_lea.vmem [#allocation10], %s4965_s14 }
 0x110   : > { %4323 = dma.done.wait (%p6325_p4), %s508_s26, 192  }
 0x111   : > { %4325 = vsyncadd (%p6325_p4), %s508_s26, 4294967104  ;;  %s6326_s10 = sld [smem:[#allocation27_spill]]  ;;  %s526_s27 = scalar_lea.sflag [#allocation12], %s489_s25 }
 0x112   : > { %p6327_p11 = scmp.ne.s32.totalorder %s6316_s1, 0 }
 0x117   : > { %s527_s11 = sand.u32 1, %s6326_s10  }
 0x118   : > { %s4973_s23 = smul.u32 12, %s527_s11 }
 0x11a   : > { %s529_s9 = scalar_lea.vmem [#allocation11], %s4973_s23 }
 0x11b   : > { %4327 = dma.done.wait (%p6327_p11), %s526_s27, 192  }
 0x11c   : > { %4329 = vsyncadd (%p6327_p11), %s526_s27, 4294967104  ;;  %p6328_p0 = scmp.eq.s32.totalorder %s4641_s30, 0 }
 0x11e   : > { %4331 = dma.done.wait (%p6328_p0), [#allocation12], 384   ;;  %p6329_p12 = pmov %p6328_p0 }
 0x11f   : > { %v4451_v0 = vmov 0.0   ;;  %v4988_v1 = vld [vmem:[%s484_s17 + $0x8] sm:$0xf]  ;;  %v4992_v2 = vld [vmem:[%s484_s17] sm:$0xff]  ;;  %s4452_s3 = smov 92   ;;  %s4453_s1 = smov 90  }
 0x120   : > { %4333 = vsyncadd (%p6329_p12), [#allocation12], 4294966912  ;;  %3512 = vmatprep.subr.mxu1 %v4451_v0  ;;  %1318 = vmatprep.mubr.f32.mxu0 %v4451_v0  ;;  %v5000_v3 = vcombine.high %v4992_v2, %v4992_v2  ;;  %s4454_s30 = smov 91   ;;  %v610_v4 = vcombine.low %v4988_v1, %v4988_v1  ;;  %v609_v5 = vcombine.low %v4992_v2, %v4992_v2  ;;  %s4455_s18 = smov 109   ;;  %vm4459_vm0 = vmmov 0   ;;  %v5044_v6 = vld [vmem:[%s493_s28] sm:$0xff] }
 0x121   : > { %675 = vrot.lane.b32.xlu1 %v4988_v1, %s4452_s3  ;;  %699 = vrot.lane.b32.xlu0 %v4988_v1, %s4453_s1  ;;  %s4456_s17 = smov 108   ;;  %s4457_s25 = smov 126   ;;  %v5050_v7 = vcombine.high %v5044_v6, %v5044_v6  ;;  %v5054_v8 = vld [vmem:[%s493_s28 + $0x8] sm:$0xf]  ;;  %v723_v10 = vcombine.low %v5044_v6, %v5044_v6  ;;  %v5100_v11 = vld [vmem:[%s502_s20] sm:$0xff]  ;;  %vm704_vm1 = vcmask 1043456  }
 0x122   : > { %s4458_s2 = smov 110   ;;  %3522 = vmatprep.mubr.msk.f32.mxu1 %vm4459_vm0, %v4451_v0  ;;  %s4460_s26 = smov 127   ;;  %v724_v9 = vcombine.low %v5054_v8, %v5054_v8  ;;  %v5106_v12 = vcombine.high %v5100_v11, %v5100_v11  ;;  %v5110_v13 = vld [vmem:[%s502_s20 + $0x8] sm:$0xf]  ;;  %v828_v15 = vcombine.low %v5100_v11, %v5100_v11  ;;  %vm701_vm2 = vcmask 736256   ;;  %v5175_v39 = vld [vmem:[%s511_s21] sm:$0xff] }
 0x123   : > { %v5122_v14 = vcombine.low %v5110_v13, %v5110_v13  ;;  %vm689_vm3 = vcmask 744448   ;;  %vm677_vm4 = vcmask 752640   ;;  %vm653_vm5 = vcmask 891904   ;;  %v5186_v44 = vld [vmem:[%s511_s21 + $0x8] sm:$0xf]  ;;  %s6330_s7 = sld [smem:[#allocation58_spill]] }
 0x124   : > { %vm665_vm6 = vcmask 883712   ;;  %v5190_v45 = vcombine.high %v5175_v39, %v5175_v39  ;;  %vm629_vm7 = vcmask 1031168   ;;  %vm641_vm8 = vcmask 900096   ;;  %s6331_s20 = sld [smem:[#allocation24_spill]] }
 0x125   : > { %685 = vrot.lane.b32.xlu0 %v4992_v2, %s4454_s30  ;;  %673 = vrot.lane.b32.xlu1 %v5000_v3, %s4452_s3  ;;  %v5204_v53 = vcombine.low %v5186_v44, %v5186_v44  ;;  %vm617_vm9 = vcmask 1039360   ;;  %vm1244_vm10 = vcmask 293888   ;;  %vm1715_vm11 = vcmask 261120   ;;  %s6332_s8 = sld [smem:[#allocation37_spill]] }
 0x126   : > { %s6333_s14 = sld [smem:[#allocation38_spill]] }
 0x127   : > { %s6334_s27 = sld [smem:[#allocation47_spill]] }
 0x129   : > { %687 = vrot.lane.b32.xlu1 %v610_v4, %s4454_s30  ;;  %697 = vrot.lane.b32.xlu0 %v5000_v3, %s4453_s1 }
 0x12a   : > { %s588_s0 = sand.u32 1, %s6331_s20  }
 0x12b   : > { %s3682_s21 = smul.u32 96, %s588_s0 }
 0x12c   : > { %s3684_s10 = smul.u32 24, %s6333_s14 }
 0x12d   : > { %671 = vrot.lane.b32.xlu1 %v4992_v2, %s4452_s3  ;;  %695 = vrot.lane.b32.xlu0 %v4992_v2, %s4453_s1  ;;  %s6043_s5 = scalar_lea.vmem [#allocation14], %s3682_s21  ;;  %p6337_p1 = scmp.ne.s32.totalorder %s6334_s27, 0 }
 0x131   : > { %649 = vrot.lane.b32.xlu1 %v5000_v3, %s4455_s18  ;;  %683 = vrot.lane.b32.xlu0 %v609_v5, %s4454_s30 }
 0x135   : > { %661 = vrot.lane.b32.xlu1 %v4992_v2, %s4456_s17  ;;  %651 = vrot.lane.b32.xlu0 %v4988_v1, %s4455_s18 }
 0x139   : > { %647 = vrot.lane.b32.xlu1 %v4992_v2, %s4455_s18  ;;  %663 = vrot.lane.b32.xlu0 %v610_v4, %s4456_s17 }
 0x13d   : > { %625 = vrot.lane.b32.xlu1 %v5000_v3, %s4457_s25  ;;  %659 = vrot.lane.b32.xlu0 %v609_v5, %s4456_s17 }
 0x141   : > { %637 = vrot.lane.b32.xlu1 %v4992_v2, %s4458_s2  ;;  %627 = vrot.lane.b32.xlu0 %v4988_v1, %s4457_s25 }
 0x145   : > { %623 = vrot.lane.b32.xlu1 %v4992_v2, %s4457_s25  ;;  %639 = vrot.lane.b32.xlu0 %v610_v4, %s4458_s2 }
 0x149   : > { %613 = vrot.lane.b32.xlu1 %v4992_v2, %s4460_s26  ;;  %635 = vrot.lane.b32.xlu0 %v609_v5, %s4458_s2 }
 0x14d   : > { %611 = vrot.lane.b32.xlu1 %v609_v5, %s4460_s26  ;;  %615 = vrot.lane.b32.xlu0 %v610_v4, %s4460_s26  ;;  %v5226_v5 = vcombine.low %v5175_v39, %v5175_v39 }
 0x151   : > { %806 = vrot.lane.b32.xlu1 %v5054_v8, %s4453_s1  ;;  %804 = vrot.lane.b32.xlu0 %v5050_v7, %s4453_s1 }
 0x155   : > { %784 = vrot.lane.b32.xlu1 %v5054_v8, %s4452_s3  ;;  %782 = vrot.lane.b32.xlu0 %v5050_v7, %s4452_s3 }
 0x159   : > { %795 = vrot.lane.b32.xlu1 %v724_v9, %s4454_s30  ;;  %793 = vrot.lane.b32.xlu0 %v5044_v6, %s4454_s30 }
 0x15d   : > { %780 = vrot.lane.b32.xlu1 %v5044_v6, %s4452_s3  ;;  %802 = vrot.lane.b32.xlu0 %v5044_v6, %s4453_s1 }
 0x161   : > { %760 = vrot.lane.b32.xlu1 %v5050_v7, %s4455_s18  ;;  %791 = vrot.lane.b32.xlu0 %v723_v10, %s4454_s30 }
 0x165   : > { %771 = vrot.lane.b32.xlu1 %v5044_v6, %s4456_s17  ;;  %762 = vrot.lane.b32.xlu0 %v5054_v8, %s4455_s18 }
 0x169   : > { %758 = vrot.lane.b32.xlu1 %v5044_v6, %s4455_s18  ;;  %773 = vrot.lane.b32.xlu0 %v724_v9, %s4456_s17 }
 0x16d   : > { %738 = vrot.lane.b32.xlu1 %v5050_v7, %s4457_s25  ;;  %769 = vrot.lane.b32.xlu0 %v723_v10, %s4456_s17 }
 0x171   : > { %749 = vrot.lane.b32.xlu1 %v5044_v6, %s4458_s2  ;;  %740 = vrot.lane.b32.xlu0 %v5054_v8, %s4457_s25 }
 0x175   : > { %736 = vrot.lane.b32.xlu1 %v5044_v6, %s4457_s25  ;;  %751 = vrot.lane.b32.xlu0 %v724_v9, %s4458_s2 }
 0x179   : > { %727 = vrot.lane.b32.xlu1 %v5044_v6, %s4460_s26  ;;  %747 = vrot.lane.b32.xlu0 %v723_v10, %s4458_s2 }
 0x17d   : > { %725 = vrot.lane.b32.xlu1 %v723_v10, %s4460_s26  ;;  %729 = vrot.lane.b32.xlu0 %v724_v9, %s4460_s26 }
 0x181   : > { %911 = vrot.lane.b32.xlu1 %v5110_v13, %s4453_s1  ;;  %909 = vrot.lane.b32.xlu0 %v5106_v12, %s4453_s1 }
 0x185   : > { %889 = vrot.lane.b32.xlu1 %v5110_v13, %s4452_s3  ;;  %887 = vrot.lane.b32.xlu0 %v5106_v12, %s4452_s3 }
 0x189   : > { %900 = vrot.lane.b32.xlu1 %v5122_v14, %s4454_s30  ;;  %898 = vrot.lane.b32.xlu0 %v5100_v11, %s4454_s30 }
 0x18d   : > { %885 = vrot.lane.b32.xlu1 %v5100_v11, %s4452_s3  ;;  %907 = vrot.lane.b32.xlu0 %v5100_v11, %s4453_s1 }
 0x191   : > { %865 = vrot.lane.b32.xlu1 %v5106_v12, %s4455_s18  ;;  %896 = vrot.lane.b32.xlu0 %v828_v15, %s4454_s30 }
 0x193   : > { %v676_v16 = vpop.permute.xlu1 %675  ;;  %v700_v17 = vpop.permute.xlu0 %699 }
 0x194   : > { %3513 = vmatpush3.msk.msra.mxu1 %vm704_vm1, %v700_v17 }
 0x195   : > { %876 = vrot.lane.b32.xlu1 %v5100_v11, %s4456_s17  ;;  %867 = vrot.lane.b32.xlu0 %v5110_v13, %s4455_s18 }
 0x196   : > { %3514 = vmatprep.subr.mxu1 %v4451_v0 }
 0x197   : > { %v686_v18 = vpop.permute.xlu0 %685  ;;  %v674_v19 = vpop.permute.xlu1 %673 }
 0x198   : > { %v679_v27 = vsel %vm677_vm4, %v674_v19, %v676_v16 }
 0x199   : > { %863 = vrot.lane.b32.xlu1 %v5100_v11, %s4455_s18  ;;  %878 = vrot.lane.b32.xlu0 %v5122_v14, %s4456_s17 }
 0x19b   : > { %v688_v20 = vpop.permute.xlu1 %687  ;;  %v698_v21 = vpop.permute.xlu0 %697 }
 0x19c   : > { %v716_v22 = vsel %vm704_vm1, %v676_v16, %v688_v20  ;;  %v703_v23 = vsel %vm701_vm2, %v698_v21, %v700_v17  ;;  %v691_v24 = vsel %vm689_vm3, %v686_v18, %v688_v20 }
 0x19d   : > { %843 = vrot.lane.b32.xlu1 %v5106_v12, %s4457_s25  ;;  %3515 = vmatpush3.msra.mxu1 %v716_v22  ;;  %v715_v29 = vsel %vm704_vm1, %v679_v27, %v691_v24 }
 0x19e   : > { %874 = vrot.lane.b32.xlu0 %v828_v15, %s4456_s17  ;;  %3366 = vmatprep.subr.msk.mxu0 %vm704_vm1, %v703_v23 }
 0x19f   : > { %v672_v25 = vpop.permute.xlu1 %671  ;;  %v696_v26 = vpop.permute.xlu0 %695  ;;  %3516 = vmatprep.subr.mxu1 %v4451_v0 }
 0x1a0   : > { %v702_v28 = vsel %vm701_vm2, %v696_v26, %v698_v21  ;;  %v678_v32 = vsel %vm677_vm4, %v672_v25, %v674_v19  ;;  %v5238_v19 = vld [vmem:[#allocation13] sm:$0xff] }
 0x1a1   : > { %854 = vrot.lane.b32.xlu1 %v5100_v11, %s4458_s2  ;;  %3367 = vmatpush1.msk.msra.mxu0 %vm704_vm1, %v702_v28 }
 0x1a2   : > { %845 = vrot.lane.b32.xlu0 %v5110_v13, %s4457_s25  ;;  %1278 = vmatprep.subr.mxu0 %v715_v29 }
 0x1a3   : > { %v650_v30 = vpop.permute.xlu1 %649  ;;  %v684_v31 = vpop.permute.xlu0 %683 }
 0x1a4   : > { %v690_v33 = vsel %vm689_vm3, %v684_v31, %v686_v18 }
 0x1a5   : > { %841 = vrot.lane.b32.xlu1 %v5100_v11, %s4457_s25  ;;  %v714_v34 = vsel %vm704_vm1, %v678_v32, %v690_v33 }
 0x1a6   : > { %856 = vrot.lane.b32.xlu0 %v5122_v14, %s4458_s2  ;;  %1279 = vmatpush1.msra.mxu0 %v714_v34 }
 0x1a7   : > { %v662_v35 = vpop.permute.xlu1 %661  ;;  %v652_v36 = vpop.permute.xlu0 %651 }
 0x1a8   : > { %v655_v40 = vsel %vm653_vm5, %v650_v30, %v652_v36 }
 0x1a9   : > { %832 = vrot.lane.b32.xlu1 %v5100_v11, %s4460_s26 }
 0x1aa   : > { %852 = vrot.lane.b32.xlu0 %v828_v15, %s4458_s2 }
 0x1ab   : > { %v648_v37 = vpop.permute.xlu1 %647  ;;  %v664_v38 = vpop.permute.xlu0 %663 }
 0x1ac   : > { %v667_v41 = vsel %vm665_vm6, %v662_v35, %v664_v38  ;;  %v713_v42 = vsel %vm704_vm1, %v652_v36, %v664_v38  ;;  %v654_v48 = vsel %vm653_vm5, %v648_v37, %v650_v30 }
 0x1ad   : > { %830 = vrot.lane.b32.xlu1 %v828_v15, %s4460_s26  ;;  %3517 = vmatpush3.msra.mxu1 %v713_v42  ;;  %v712_v43 = vsel %vm704_vm1, %v655_v40, %v667_v41  ;;  %v5309_v41 = vld [vmem:[%s520_s29] sm:$0xff] }
 0x1ae   : > { %834 = vrot.lane.b32.xlu0 %v5122_v14, %s4460_s26  ;;  %1280 = vmatprep.subr.mxu0 %v712_v43 }
 0x1af   : > { %v626_v46 = vpop.permute.xlu1 %625  ;;  %v660_v47 = vpop.permute.xlu0 %659  ;;  %3518 = vmatprep.subr.mxu1 %v4451_v0 }
 0x1b0   : > { %v666_v49 = vsel %vm665_vm6, %v660_v47, %v662_v35 }
 0x1b1   : > { %1016 = vrot.lane.b32.xlu1 %v5186_v44, %s4453_s1  ;;  %v711_v50 = vsel %vm704_vm1, %v654_v48, %v666_v49  ;;  %v5327_v48 = vld [vmem:[%s520_s29 + $0x8] sm:$0xf]  ;;  %v5331_v49 = vcombine.high %v5309_v41, %v5309_v41  ;;  %s3683_s29 = smul.u32 12, %s6332_s8 }
 0x1b2   : > { %1014 = vrot.lane.b32.xlu0 %v5190_v45, %s4453_s1  ;;  %1281 = vmatpush1.msra.mxu0 %v711_v50 }
 0x1b3   : > { %v638_v51 = vpop.permute.xlu1 %637  ;;  %v628_v52 = vpop.permute.xlu0 %627  ;;  %s3093_s11 = sadd.s32 %s3684_s10, %s3683_s29 }
 0x1b4   : > { %v631_v56 = vsel %vm629_vm7, %v626_v46, %v628_v52  ;;  %s3437_s23 = sshll.u32 %s3093_s11, 7 }
 0x1b5   : > { %994 = vrot.lane.b32.xlu1 %v5186_v44, %s4452_s3 }
 0x1b6   : > { %992 = vrot.lane.b32.xlu0 %v5190_v45, %s4452_s3 }
 0x1b7   : > { %v624_v54 = vpop.permute.xlu1 %623  ;;  %v640_v55 = vpop.permute.xlu0 %639 }
 0x1b8   : > { %v643_v57 = vsel %vm641_vm8, %v638_v51, %v640_v55  ;;  %v710_v58 = vsel %vm704_vm1, %v628_v52, %v640_v55  ;;  %v630_v62 = vsel %vm629_vm7, %v624_v54, %v626_v46 }
 0x1b9   : > { %1005 = vrot.lane.b32.xlu1 %v5204_v53, %s4454_s30  ;;  %3519 = vmatpush3.msra.mxu1 %v710_v58  ;;  %v709_v59 = vsel %vm704_vm1, %v631_v56, %v643_v57  ;;  %v5348_v57 = vcombine.low %v5327_v48, %v5327_v48 }
 0x1ba   : > { %1003 = vrot.lane.b32.xlu0 %v5175_v39, %s4454_s30  ;;  %1282 = vmatprep.subr.mxu0 %v709_v59 }
 0x1bb   : > { %v614_v60 = vpop.permute.xlu1 %613  ;;  %v636_v61 = vpop.permute.xlu0 %635  ;;  %3520 = vmatprep.subr.mxu1 %v4451_v0 }
 0x1bc   : > { %v642_v63 = vsel %vm641_vm8, %v636_v61, %v638_v51 }
 0x1bd   : > { %990 = vrot.lane.b32.xlu1 %v5175_v39, %s4452_s3  ;;  %v708_v4 = vsel %vm704_vm1, %v630_v62, %v642_v63 }
 0x1be   : > { %1012 = vrot.lane.b32.xlu0 %v5175_v39, %s4453_s1  ;;  %1283 = vmatpush1.msra.mxu0 %v708_v4 }
 0x1bf   : > { %v612_v9 = vpop.permute.xlu1 %611  ;;  %v616_v10 = vpop.permute.xlu0 %615 }
 0x1c0   : > { %v618_v14 = vsel %vm617_vm9, %v612_v9, %v614_v60  ;;  %v619_v15 = vsel %vm617_vm9, %v614_v60, %v616_v10  ;;  %v707_v16 = vsel %vm704_vm1, %v4988_v1, %v616_v10 }
 0x1c1   : > { %970 = vrot.lane.b32.xlu1 %v5190_v45, %s4455_s18  ;;  %3521 = vmatpush3.msra.mxu1 %v707_v16  ;;  %v706_v17 = vsel %vm704_vm1, %v5000_v3, %v619_v15  ;;  %v705_v18 = vsel %vm704_vm1, %v4992_v2, %v618_v14  ;;  %v5379_v15 = vcombine.low %v5309_v41, %v5309_v41 }
 0x1c2   : > { %1001 = vrot.lane.b32.xlu0 %v5226_v5, %s4454_s30  ;;  %1284 = vmatprep.subr.mxu0 %v706_v17 }
 0x1c3   : > { %v5242_v20 = vpop.permute.xlu1 %806  ;;  %1285 = vmatpush1.msra.mxu0 %v705_v18  ;;  %v805_v1 = vpop.permute.xlu0 %804  ;;  %3525 = vmatprep.subr.mxu1 %v4451_v0 }
 0x1c4   : > { %3523 = vmatmul.mubr.msk.f32.vlgmr.msra.gmra.mxu1 %vm1244_vm10, %v5238_v19  ;;  %v5249_v3 = vsel %vm701_vm2, %v805_v1, %v5242_v20  ;;  %3368 = vmatmul.mubr.msk.f32.vlgmr.msra.gmra.mxu0 %vm1244_vm10, %v5238_v19 }
 0x1c5   : > { %981 = vrot.lane.b32.xlu1 %v5175_v39, %s4456_s17  ;;  %3371 = vmatprep.subr.msk.mxu0 %vm704_vm1, %v5249_v3 }
 0x1c6   : > { %972 = vrot.lane.b32.xlu0 %v5186_v44, %s4455_s18  ;;  %3526 = vmatpush3.msk.msra.mxu1 %vm704_vm1, %v5242_v20 }
 0x1c7   : > { %v785_v2 = vpop.permute.xlu1 %784  ;;  %v783_v21 = vpop.permute.xlu0 %782  ;;  %3527 = vmatprep.subr.mxu1 %v4451_v0  ;;  %3535 = vmatprep.mubr.msk.f32.mxu1 %vm4459_vm0, %v4451_v0 }
 0x1c8   : > { %1478 = vmatprep.mubr.f32.mxu0 %v4451_v0  ;;  %v787_v28 = vsel %vm677_vm4, %v783_v21, %v785_v2 }
 0x1c9   : > { %968 = vrot.lane.b32.xlu1 %v5175_v39, %s4455_s18 }
 0x1ca   : > { %983 = vrot.lane.b32.xlu0 %v5204_v53, %s4456_s17 }
 0x1cb   : > { %v796_v22 = vpop.permute.xlu1 %795  ;;  %v794_v23 = vpop.permute.xlu0 %793 }
 0x1cc   : > { %v5270_v24 = vsel %vm704_vm1, %v785_v2, %v796_v22  ;;  %v798_v25 = vsel %vm689_vm3, %v794_v23, %v796_v22 }
 0x1cd   : > { %948 = vrot.lane.b32.xlu1 %v5190_v45, %s4457_s25  ;;  %3528 = vmatpush3.msra.mxu1 %v5270_v24  ;;  %v5288_v30 = vsel %vm704_vm1, %v787_v28, %v798_v25 }
 0x1ce   : > { %979 = vrot.lane.b32.xlu0 %v5226_v5, %s4456_s17  ;;  %3529 = vmatprep.subr.mxu1 %v4451_v0 }
 0x1cf   : > { %v781_v26 = vpop.permute.xlu1 %780  ;;  %v803_v27 = vpop.permute.xlu0 %802 }
 0x1d0   : > { %v5281_v29 = vsel %vm701_vm2, %v803_v27, %v805_v1  ;;  %v786_v33 = vsel %vm677_vm4, %v781_v26, %v783_v21 }
 0x1d1   : > { %959 = vrot.lane.b32.xlu1 %v5175_v39, %s4458_s2  ;;  %3372 = vmatpush1.msk.msra.mxu0 %vm704_vm1, %v5281_v29 }
 0x1d2   : > { %950 = vrot.lane.b32.xlu0 %v5186_v44, %s4457_s25  ;;  %1438 = vmatprep.subr.mxu0 %v5288_v30 }
 0x1d3   : > { %v761_v31 = vpop.permute.xlu1 %760  ;;  %v792_v32 = vpop.permute.xlu0 %791 }
 0x1d4   : > { %v797_v34 = vsel %vm689_vm3, %v792_v32, %v794_v23  ;;  %v5398_v23 = vld [vmem:[#allocation13 + $0x8] sm:$0xff] }
 0x1d5   : > { %946 = vrot.lane.b32.xlu1 %v5175_v39, %s4457_s25  ;;  %v5298_v35 = vsel %vm704_vm1, %v786_v33, %v797_v34 }
 0x1d6   : > { %961 = vrot.lane.b32.xlu0 %v5204_v53, %s4458_s2  ;;  %1439 = vmatpush1.msra.mxu0 %v5298_v35 }
 0x1d7   : > { %v772_v36 = vpop.permute.xlu1 %771  ;;  %v763_v37 = vpop.permute.xlu0 %762 }
 0x1d8   : > { %v765_v42 = vsel %vm653_vm5, %v761_v31, %v763_v37 }
 0x1d9   : > { %937 = vrot.lane.b32.xlu1 %v5175_v39, %s4460_s26 }
 0x1da   : > { %957 = vrot.lane.b32.xlu0 %v5226_v5, %s4458_s2 }
 0x1db   : > { %v759_v38 = vpop.permute.xlu1 %758  ;;  %v774_v40 = vpop.permute.xlu0 %773 }
 0x1dc   : > { %v776_v43 = vsel %vm665_vm6, %v772_v36, %v774_v40  ;;  %v5314_v46 = vsel %vm704_vm1, %v763_v37, %v774_v40  ;;  %v764_v52 = vsel %vm653_vm5, %v759_v38, %v761_v31 }
 0x1dd   : > { %935 = vrot.lane.b32.xlu1 %v5226_v5, %s4460_s26  ;;  %3530 = vmatpush3.msra.mxu1 %v5314_v46  ;;  %v5320_v47 = vsel %vm704_vm1, %v765_v42, %v776_v43 }
 0x1de   : > { %939 = vrot.lane.b32.xlu0 %v5204_v53, %s4460_s26  ;;  %1440 = vmatprep.subr.mxu0 %v5320_v47 }
 0x1df   : > { %v739_v50 = vpop.permute.xlu1 %738  ;;  %v770_v51 = vpop.permute.xlu0 %769  ;;  %3531 = vmatprep.subr.mxu1 %v4451_v0 }
 0x1e0   : > { %v775_v54 = vsel %vm665_vm6, %v770_v51, %v772_v36 }
 0x1e1   : > { %1121 = vrot.lane.b32.xlu1 %v5327_v48, %s4453_s1  ;;  %v5339_v53 = vsel %vm704_vm1, %v764_v52, %v775_v54 }
 0x1e2   : > { %1119 = vrot.lane.b32.xlu0 %v5331_v49, %s4453_s1  ;;  %1441 = vmatpush1.msra.mxu0 %v5339_v53 }
 0x1e3   : > { %v750_v55 = vpop.permute.xlu1 %749  ;;  %v741_v56 = vpop.permute.xlu0 %740 }
 0x1e4   : > { %v743_v60 = vsel %vm629_vm7, %v739_v50, %v741_v56 }
 0x1e5   : > { %1099 = vrot.lane.b32.xlu1 %v5327_v48, %s4452_s3 }
 0x1e6   : > { %1097 = vrot.lane.b32.xlu0 %v5331_v49, %s4452_s3 }
 0x1e7   : > { %v737_v58 = vpop.permute.xlu1 %736  ;;  %v752_v59 = vpop.permute.xlu0 %751 }
 0x1e8   : > { %v754_v61 = vsel %vm641_vm8, %v750_v55, %v752_v59  ;;  %v5355_v62 = vsel %vm704_vm1, %v741_v56, %v752_v59  ;;  %v742_v9 = vsel %vm629_vm7, %v737_v58, %v739_v50  ;;  %v5471_v58 = vld [vmem:[%s529_s9] sm:$0xff] }
 0x1e9   : > { %1110 = vrot.lane.b32.xlu1 %v5348_v57, %s4454_s30  ;;  %3532 = vmatpush3.msra.mxu1 %v5355_v62  ;;  %v5361_v63 = vsel %vm704_vm1, %v743_v60, %v754_v61 }
 0x1ea   : > { %1108 = vrot.lane.b32.xlu0 %v5309_v41, %s4454_s30  ;;  %1442 = vmatprep.subr.mxu0 %v5361_v63 }
 0x1eb   : > { %v728_v4 = vpop.permute.xlu1 %727  ;;  %v748_v5 = vpop.permute.xlu0 %747  ;;  %3533 = vmatprep.subr.mxu1 %v4451_v0 }
 0x1ec   : > { %v753_v10 = vsel %vm641_vm8, %v748_v5, %v750_v55  ;;  %v5489_v5 = vld [vmem:[%s529_s9 + $0x8] sm:$0xf]  ;;  %s3096_s9 = sshll.u32 %s6043_s5, 4  ;;  %s6076_s9 = int_to_ptr.vmem [resolvable:$true] %s3096_s9 }
 0x1ed   : > { %1095 = vrot.lane.b32.xlu1 %v5309_v41, %s4452_s3  ;;  %v5372_v14 = vsel %vm704_vm1, %v742_v9, %v753_v10  ;;  %v5493_v9 = vcombine.high %v5471_v58, %v5471_v58 }
 0x1ee   : > { %1117 = vrot.lane.b32.xlu0 %v5309_v41, %s4453_s1  ;;  %1443 = vmatpush1.msra.mxu0 %v5372_v14 }
 0x1ef   : > { %v726_v16 = vpop.permute.xlu1 %725  ;;  %v730_v17 = vpop.permute.xlu0 %729 }
 0x1f0   : > { %v731_v18 = vsel %vm617_vm9, %v726_v16, %v728_v4  ;;  %v732_v1 = vsel %vm617_vm9, %v728_v4, %v730_v17  ;;  %v5385_v2 = vsel %vm704_vm1, %v5054_v8, %v730_v17 }
 0x1f1   : > { %1075 = vrot.lane.b32.xlu1 %v5331_v49, %s4455_s18  ;;  %3534 = vmatpush3.msra.mxu1 %v5385_v2  ;;  %v5392_v21 = vsel %vm704_vm1, %v5050_v7, %v732_v1  ;;  %v5396_v22 = vsel %vm704_vm1, %v5044_v6, %v731_v18 }
 0x1f2   : > { %1106 = vrot.lane.b32.xlu0 %v5379_v15, %s4454_s30  ;;  %1444 = vmatprep.subr.mxu0 %v5392_v21 }
 0x1f3   : > { %v5403_v8 = vpop.permute.xlu1 %911  ;;  %1445 = vmatpush1.msra.mxu0 %v5396_v22  ;;  %v910_v25 = vpop.permute.xlu0 %909  ;;  %3538 = vmatprep.subr.mxu1 %v4451_v0 }
 0x1f4   : > { %v5409_v7 = vsel %vm701_vm2, %v910_v25, %v5403_v8  ;;  %3536 = vmatmul.mubr.msk.f32.vlgmr.msra.gmra.mxu1 %vm1244_vm10, %v5398_v23  ;;  %3373 = vmatmul.mubr.msk.f32.vlgmr.msra.gmra.mxu0 %vm1244_vm10, %v5398_v23 }
 0x1f5   : > { %1086 = vrot.lane.b32.xlu1 %v5309_v41, %s4456_s17  ;;  %3376 = vmatprep.subr.msk.mxu0 %vm704_vm1, %v5409_v7 }
 0x1f6   : > { %1077 = vrot.lane.b32.xlu0 %v5327_v48, %s4455_s18  ;;  %3539 = vmatpush3.msk.msra.mxu1 %vm704_vm1, %v5403_v8 }
 0x1f7   : > { %v890_v6 = vpop.permute.xlu1 %889  ;;  %v888_v26 = vpop.permute.xlu0 %887  ;;  %3540 = vmatprep.subr.mxu1 %v4451_v0  ;;  %3548 = vmatprep.mubr.msk.f32.mxu1 %vm4459_vm0, %v4451_v0 }
 0x1f8   : > { %1633 = vmatprep.mubr.f32.mxu0 %v4451_v0  ;;  %v892_v36 = vsel %vm677_vm4, %v888_v26, %v890_v6 }
 0x1f9   : > { %1073 = vrot.lane.b32.xlu1 %v5309_v41, %s4455_s18 }
 0x1fa   : > { %1088 = vrot.lane.b32.xlu0 %v5348_v57, %s4456_s17 }
 0x1fb   : > { %v901_v27 = vpop.permute.xlu1 %900  ;;  %v899_v28 = vpop.permute.xlu0 %898 }
 0x1fc   : > { %v5432_v31 = vsel %vm704_vm1, %v890_v6, %v901_v27  ;;  %v903_v32 = vsel %vm689_vm3, %v899_v28, %v901_v27  ;;  %v5510_v6 = vcombine.low %v5489_v5, %v5489_v5 }
 0x1fd   : > { %1053 = vrot.lane.b32.xlu1 %v5331_v49, %s4457_s25  ;;  %3541 = vmatpush3.msra.mxu1 %v5432_v31  ;;  %v5450_v38 = vsel %vm704_vm1, %v892_v36, %v903_v32 }
 0x1fe   : > { %1084 = vrot.lane.b32.xlu0 %v5379_v15, %s4456_s17  ;;  %3542 = vmatprep.subr.mxu1 %v4451_v0 }
 0x1ff   : > { %v886_v33 = vpop.permute.xlu1 %885  ;;  %v908_v34 = vpop.permute.xlu0 %907 }
 0x200   : > { %v5443_v37 = vsel %vm701_vm2, %v908_v34, %v910_v25  ;;  %v891_v43 = vsel %vm677_vm4, %v886_v33, %v888_v26 }
 0x201   : > { %1064 = vrot.lane.b32.xlu1 %v5309_v41, %s4458_s2  ;;  %3377 = vmatpush1.msk.msra.mxu0 %vm704_vm1, %v5443_v37 }
 0x202   : > { %1055 = vrot.lane.b32.xlu0 %v5327_v48, %s4457_s25  ;;  %1593 = vmatprep.subr.mxu0 %v5450_v38 }
 0x203   : > { %v866_v40 = vpop.permute.xlu1 %865  ;;  %v897_v42 = vpop.permute.xlu0 %896 }
 0x204   : > { %v902_v50 = vsel %vm689_vm3, %v897_v42, %v899_v28 }
 0x205   : > { %1051 = vrot.lane.b32.xlu1 %v5309_v41, %s4457_s25  ;;  %v5460_v51 = vsel %vm704_vm1, %v891_v43, %v902_v50 }
 0x206   : > { %1066 = vrot.lane.b32.xlu0 %v5348_v57, %s4458_s2  ;;  %1594 = vmatpush1.msra.mxu0 %v5460_v51 }
 0x207   : > { %v877_v52 = vpop.permute.xlu1 %876  ;;  %v868_v54 = vpop.permute.xlu0 %867 }
 0x208   : > { %v870_v59 = vsel %vm653_vm5, %v866_v40, %v868_v54 }
 0x209   : > { %1042 = vrot.lane.b32.xlu1 %v5309_v41, %s4460_s26 }
 0x20a   : > { %1062 = vrot.lane.b32.xlu0 %v5379_v15, %s4458_s2 }
 0x20b   : > { %v864_v55 = vpop.permute.xlu1 %863  ;;  %v879_v56 = vpop.permute.xlu0 %878 }
 0x20c   : > { %v881_v60 = vsel %vm665_vm6, %v877_v52, %v879_v56  ;;  %v5476_v61 = vsel %vm704_vm1, %v868_v54, %v879_v56  ;;  %v869_v17 = vsel %vm653_vm5, %v864_v55, %v866_v40 }
 0x20d   : > { %1040 = vrot.lane.b32.xlu1 %v5379_v15, %s4460_s26  ;;  %3543 = vmatpush3.msra.mxu1 %v5476_v61  ;;  %v5482_v4 = vsel %vm704_vm1, %v870_v59, %v881_v60  ;;  %v4461_v15 = vmov 0  }
 0x20e   : > { %1044 = vrot.lane.b32.xlu0 %v5348_v57, %s4460_s26  ;;  %1595 = vmatprep.subr.mxu0 %v5482_v4 }
 0x20f   : > { %v844_v10 = vpop.permute.xlu1 %843  ;;  %3544 = vmatprep.subr.mxu1 %v4451_v0  ;;  %3958 = vset.pattern.permute.xlu0 %v4461_v15  ;;  %v5555_v15 = vld [vmem:[#allocation13 + $0x10] sm:$0xff] }
 0x210   : > { %v875_v16 = vpop.permute.xlu0 %874 }
 0x211   : > { %v880_v18 = vsel %vm665_vm6, %v875_v16, %v877_v52  ;;  %1226 = vrot.lane.b32.xlu1 %v5489_v5, %s4453_s1  ;;  %v5540_v52 = vcombine.low %v5471_v58, %v5471_v58 }
 0x212   : > { %1224 = vrot.lane.b32.xlu0 %v5493_v9, %s4453_s1  ;;  %v5503_v57 = vsel %vm704_vm1, %v869_v17, %v880_v18 }
 0x213   : > { %1596 = vmatpush1.msra.mxu0 %v5503_v57  ;;  %v855_v1 = vpop.permute.xlu1 %854 }
 0x214   : > { %v846_v25 = vpop.permute.xlu0 %845 }
 0x215   : > { %1204 = vrot.lane.b32.xlu1 %v5489_v5, %s4452_s3  ;;  %v848_v28 = vsel %vm629_vm7, %v844_v10, %v846_v25 }
 0x216   : > { %1202 = vrot.lane.b32.xlu0 %v5493_v9, %s4452_s3 }
 0x217   : > { %v842_v26 = vpop.permute.xlu1 %841 }
 0x218   : > { %v857_v27 = vpop.permute.xlu0 %856  ;;  %v847_v42 = vsel %vm629_vm7, %v842_v26, %v844_v10 }
 0x219   : > { %v859_v32 = vsel %vm641_vm8, %v855_v1, %v857_v27  ;;  %v5517_v33 = vsel %vm704_vm1, %v846_v25, %v857_v27  ;;  %1215 = vrot.lane.b32.xlu1 %v5510_v6, %s4454_s30 }
 0x21a   : > { %1213 = vrot.lane.b32.xlu0 %v5471_v58, %s4454_s30  ;;  %3545 = vmatpush3.msra.mxu1 %v5517_v33  ;;  %v5525_v34 = vsel %vm704_vm1, %v848_v28, %v859_v32 }
 0x21b   : > { %1597 = vmatprep.subr.mxu0 %v5525_v34  ;;  %v833_v36 = vpop.permute.xlu1 %832  ;;  %3546 = vmatprep.subr.mxu1 %v4451_v0 }
 0x21c   : > { %v853_v40 = vpop.permute.xlu0 %852 }
 0x21d   : > { %v858_v43 = vsel %vm641_vm8, %v853_v40, %v855_v1  ;;  %1200 = vrot.lane.b32.xlu1 %v5471_v58, %s4452_s3 }
 0x21e   : > { %1222 = vrot.lane.b32.xlu0 %v5471_v58, %s4453_s1  ;;  %v5536_v50 = vsel %vm704_vm1, %v847_v42, %v858_v43 }
 0x21f   : > { %1598 = vmatpush1.msra.mxu0 %v5536_v50  ;;  %v831_v54 = vpop.permute.xlu1 %830 }
 0x220   : > { %v836_v55 = vsel %vm617_vm9, %v831_v54, %v833_v36  ;;  %v835_v56 = vpop.permute.xlu0 %834 }
 0x221   : > { %v837_v59 = vsel %vm617_vm9, %v833_v36, %v835_v56  ;;  %v5547_v60 = vsel %vm704_vm1, %v5110_v13, %v835_v56  ;;  %1180 = vrot.lane.b32.xlu1 %v5493_v9, %s4455_s18  ;;  %v5553_v10 = vsel %vm704_vm1, %v5100_v11, %v836_v55 }
 0x222   : > { %1211 = vrot.lane.b32.xlu0 %v5540_v52, %s4454_s30  ;;  %3547 = vmatpush3.msra.mxu1 %v5547_v60  ;;  %v5562_v16 = vsel %vm704_vm1, %v5106_v12, %v837_v59  ;;  %s6335_s30 = sld [smem:[#allocation59_spill]] }
 0x223   : > { %1599 = vmatprep.subr.mxu0 %v5562_v16  ;;  %3551 = vmatprep.subr.mxu1 %v4451_v0  ;;  %v5566_v13 = vpop.permute.xlu1 %1016 }
 0x224   : > { %1600 = vmatpush1.msra.mxu0 %v5553_v10  ;;  %3549 = vmatmul.mubr.msk.f32.vlgmr.msra.gmra.mxu1 %vm1244_vm10, %v5555_v15  ;;  %v5571_v11 = vpop.permute.xlu0 %1014 }
 0x225   : > { %3552 = vmatpush3.msk.msra.mxu1 %vm704_vm1, %v5242_v20  ;;  %3381 = vmatprep.subr.msk.mxu0 %vm704_vm1, %v5249_v3 }
 0x226   : > { %3553 = vmatprep.subr.mxu1 %v4451_v0  ;;  %1191 = vrot.lane.b32.xlu1 %v5471_v58, %s4456_s17 }
 0x227   : > { %1182 = vrot.lane.b32.xlu0 %v5489_v5, %s4455_s18  ;;  %3378 = vmatmul.mubr.msk.f32.vlgmr.msra.gmra.mxu0 %vm1244_vm10, %v5555_v15  ;;  %v5584_v12 = vpop.permute.xlu1 %994 }
 0x228   : > { %3382 = vmatpush1.msk.msra.mxu0 %vm704_vm1, %v5281_v29  ;;  %3554 = vmatpush3.msra.mxu1 %v5270_v24  ;;  %v5589_v20 = vpop.permute.xlu0 %992 }
 0x229   : > { %1745 = vmatprep.subr.mxu0 %v5288_v30  ;;  %3555 = vmatprep.subr.mxu1 %v4451_v0  ;;  %v997_v17 = vsel %vm677_vm4, %v5589_v20, %v5584_v12 }
 0x22a   : > { %1746 = vmatpush1.msra.mxu0 %v5298_v35  ;;  %3556 = vmatpush3.msra.mxu1 %v5314_v46 }
 0x22b   : > { %1747 = vmatprep.subr.mxu0 %v5320_v47  ;;  %3557 = vmatprep.subr.mxu1 %v4451_v0  ;;  %v1006_v3 = vpop.permute.xlu1 %1005 }
 0x22c   : > { %1178 = vrot.lane.b32.xlu1 %v5471_v58, %s4455_s18  ;;  %1193 = vrot.lane.b32.xlu0 %v5510_v6, %s4456_s17  ;;  %v1004_v24 = vpop.permute.xlu0 %1003  ;;  %v5674_v18 = vsel %vm704_vm1, %v5584_v12, %v1006_v3  ;;  %s6074_s18 = scalar_lea.hbm %s6335_s30, %s3437_s23 }
 0x22d   : > { %1748 = vmatpush1.msra.mxu0 %v5339_v53  ;;  %3558 = vmatpush3.msra.mxu1 %v5355_v62 }
 0x22e   : > { %1749 = vmatprep.subr.mxu0 %v5361_v63  ;;  %3559 = vmatprep.subr.mxu1 %v4451_v0 }
 0x22f   : > { %1750 = vmatpush1.msra.mxu0 %v5372_v14  ;;  %3560 = vmatpush3.msra.mxu1 %v5385_v2  ;;  %v5607_v29 = vpop.permute.xlu1 %990 }
 0x230   : > { %1751 = vmatprep.subr.mxu0 %v5392_v21  ;;  %3561 = vmatprep.mubr.msk.f32.mxu1 %vm4459_vm0, %v4451_v0  ;;  %v1013_v30 = vpop.permute.xlu0 %1012  ;;  %v5659_v21 = vsel %vm701_vm2, %v5571_v11, %v5566_v13  ;;  %v996_v40 = vsel %vm677_vm4, %v5607_v29, %v5589_v20 }
 0x231   : > { %3564 = vmatprep.subr.mxu1 %v4451_v0  ;;  %1158 = vrot.lane.b32.xlu1 %v5493_v9, %s4457_s25  ;;  %v5683_v27 = vsel %vm701_vm2, %v1013_v30, %v5571_v11 }
 0x232   : > { %1189 = vrot.lane.b32.xlu0 %v5540_v52, %s4456_s17  ;;  %1752 = vmatpush1.msra.mxu0 %v5396_v22  ;;  %v1008_v22 = vsel %vm689_vm3, %v1004_v24, %v1006_v3  ;;  %s6082_s17 = scalar_lea.sflag [#allocation4], %s588_s0 }
 0x233   : > { %3562 = vmatmul.mubr.msk.f32.vlgmr.msra.gmra.mxu1 %vm1244_vm10, %v5238_v19  ;;  %1785 = vmatprep.mubr.f32.mxu0 %v4451_v0  ;;  %v971_v35 = vpop.permute.xlu1 %970  ;;  %v5690_v28 = vsel %vm704_vm1, %v997_v17, %v1008_v22 }
 0x234   : > { %3565 = vmatpush3.msk.msra.mxu1 %vm704_vm1, %v5403_v8  ;;  %3386 = vmatprep.subr.msk.mxu0 %vm704_vm1, %v5409_v7  ;;  %v1002_v46 = vpop.permute.xlu0 %1001 }
 0x235   : > { %3566 = vmatprep.subr.mxu1 %v4451_v0  ;;  %3383 = vmatmul.mubr.msk.f32.vlgmr.msra.gmra.mxu0 %vm1244_vm10, %v5238_v19  ;;  %v1007_v1 = vsel %vm689_vm3, %v1002_v46, %v1004_v24 }
 0x236   : > { %3387 = vmatpush1.msk.msra.mxu0 %vm704_vm1, %v5443_v37  ;;  %3567 = vmatpush3.msra.mxu1 %v5432_v31  ;;  %v5706_v55 = vsel %vm704_vm1, %v996_v40, %v1007_v1 }
 0x237   : > { %1893 = vmatprep.subr.mxu0 %v5450_v38  ;;  %3568 = vmatprep.subr.mxu1 %v4451_v0  ;;  %v982_v47 = vpop.permute.xlu1 %981 }
 0x238   : > { %1169 = vrot.lane.b32.xlu1 %v5471_v58, %s4458_s2  ;;  %1160 = vrot.lane.b32.xlu0 %v5489_v5, %s4457_s25  ;;  %v973_v53 = vpop.permute.xlu0 %972 }
 0x239   : > { %1894 = vmatpush1.msra.mxu0 %v5460_v51  ;;  %3569 = vmatpush3.msra.mxu1 %v5476_v61  ;;  %v975_v42 = vsel %vm653_vm5, %v971_v35, %v973_v53 }
 0x23a   : > { %1895 = vmatprep.subr.mxu0 %v5482_v4  ;;  %3570 = vmatprep.subr.mxu1 %v4451_v0 }
 0x23b   : > { %1896 = vmatpush1.msra.mxu0 %v5503_v57  ;;  %3571 = vmatpush3.msra.mxu1 %v5517_v33  ;;  %v969_v62 = vpop.permute.xlu1 %968 }
 0x23c   : > { %1897 = vmatprep.subr.mxu0 %v5525_v34  ;;  %3572 = vmatprep.subr.mxu1 %v4451_v0  ;;  %v984_v63 = vpop.permute.xlu0 %983  ;;  %v974_v54 = vsel %vm653_vm5, %v969_v62, %v971_v35 }
 0x23d   : > { %1156 = vrot.lane.b32.xlu1 %v5471_v58, %s4457_s25  ;;  %1171 = vrot.lane.b32.xlu0 %v5510_v6, %s4458_s2  ;;  %v986_v25 = vsel %vm665_vm6, %v982_v47, %v984_v63  ;;  %v5701_v43 = vsel %vm704_vm1, %v973_v53, %v984_v63  ;;  %s4176_s25 = scalar_lea.vmem %s6076_s9, 1536 }
 0x23e   : > { %1898 = vmatpush1.msra.mxu0 %v5536_v50  ;;  %3573 = vmatpush3.msra.mxu1 %v5547_v60  ;;  %v5710_v56 = vsel %vm704_vm1, %v975_v42, %v986_v25  ;;  %p4177_p10 = scmp.ne.s32.totalorder %s6076_s9, %s4176_s25 }
 0x23f   : > { %1899 = vmatprep.subr.mxu0 %v5562_v16  ;;  %3574 = vmatprep.mubr.msk.f32.mxu1 %vm4459_vm0, %v4451_v0  ;;  %v949_v14 = vpop.permute.xlu1 %948 }
 0x240   : > { %3577 = vmatprep.subr.mxu1 %v4451_v0  ;;  %1900 = vmatpush1.msra.mxu0 %v5553_v10  ;;  %v980_v2 = vpop.permute.xlu0 %979  ;;  %p4178_p9 = pnand %p4177_p10, %p6337_p1 }
 0x241   : > { %3575 = vmatmul.mubr.msk.f32.vlgmr.msra.gmra.mxu1 %vm1244_vm10, %v5398_v23  ;;  %1933 = vmatprep.mubr.f32.mxu0 %v4451_v0  ;;  %v985_v32 = vsel %vm665_vm6, %v980_v2, %v982_v47 }
 0x242   : > { %3578 = vmatpush3.msk.msra.mxu1 %vm704_vm1, %v5566_v13  ;;  %3391 = vmatprep.subr.msk.mxu0 %vm704_vm1, %v5659_v21  ;;  %v5716_v59 = vsel %vm704_vm1, %v974_v54, %v985_v32  ;;  %p4179_p8 = pneg %p4178_p9 }
 0x243   : > { %3579 = vmatprep.subr.mxu1 %v4451_v0  ;;  %1147 = vrot.lane.b32.xlu1 %v5471_v58, %s4460_s26  ;;  %v960_v26 = vpop.permute.xlu1 %959 }
 0x244   : > { %1167 = vrot.lane.b32.xlu0 %v5540_v52, %s4458_s2  ;;  %3388 = vmatmul.mubr.msk.f32.vlgmr.msra.gmra.mxu0 %vm1244_vm10, %v5398_v23  ;;  %v951_v36 = vpop.permute.xlu0 %950  ;;  %s6336_s2 = smov %s6335_s30 }
 0x245   : > { %3392 = vmatpush1.msk.msra.mxu0 %vm704_vm1, %v5683_v27  ;;  %3580 = vmatpush3.msra.mxu1 %v5674_v18  ;;  %v953_v20 = vsel %vm629_vm7, %v949_v14, %v951_v36 }
 0x246   : > { %2047 = vmatprep.subr.mxu0 %v5690_v28  ;;  %3581 = vmatprep.subr.mxu1 %v4451_v0 }
 0x247   : > { %2048 = vmatpush1.msra.mxu0 %v5706_v55  ;;  %1145 = vrot.lane.b32.xlu1 %v5540_v52, %s4460_s26  ;;  %v947_v11 = vpop.permute.xlu1 %946  ;;  %v1242_v52 = vld [vmem:[%s6330_s7] sm:$0xff] }
 0x248   : > { %1149 = vrot.lane.b32.xlu0 %v5510_v6, %s4460_s26  ;;  %3582 = vmatpush3.msra.mxu1 %v5701_v43  ;;  %v962_v12 = vpop.permute.xlu0 %961  ;;  %v952_v35 = vsel %vm629_vm7, %v947_v11, %v949_v14  ;;  %s4462_s26 = smov [#allocation14]  }
 0x249   : > { %2049 = vmatprep.subr.mxu0 %v5710_v56  ;;  %v964_v3 = vsel %vm641_vm8, %v960_v26, %v962_v12  ;;  %v5725_v24 = vsel %vm704_vm1, %v951_v36, %v962_v12  ;;  %3583 = vmatprep.subr.mxu1 %v4451_v0  ;;  %s4180_s6 = sshll.u32 %s4462_s26, 4  ;;  %s4181_s6 = int_to_ptr.vmem [resolvable:$false] %s4180_s6 }
 0x24a   : > { %2050 = vmatpush1.msra.mxu0 %v5716_v59  ;;  %3584 = vmatpush3.msra.mxu1 %v5725_v24  ;;  %v5731_v6 = vsel %vm704_vm1, %v953_v20, %v964_v3  ;;  %s4182_s28 = scalar_lea.vmem %s4181_s6, 3072  ;;  %p4183_p6 = scmp.lt.s32.totalorder %s6076_s9, %s4181_s6 }
 0x24b   : > { %2051 = vmatprep.subr.mxu0 %v5731_v6  ;;  %v938_v29 = vpop.permute.xlu1 %937  ;;  %3585 = vmatprep.subr.mxu1 %v4451_v0  ;;  %p4184_p7 = scmp.lt.s32.totalorder %s4182_s28, %s4176_s25 }
 0x24c   : > { %v958_v30 = vpop.permute.xlu0 %957  ;;  %3587 = vmatprep.mubr.msk.f32.mxu1 %vm4459_vm0, %v4451_v0  ;;  %2087 = vmatprep.mubr.f32.mxu0 %v4451_v0 }
 0x24d   : > { %v963_v46 = vsel %vm641_vm8, %v958_v30, %v960_v26  ;;  %1397 = vperm.xlu0 %3958, %v1242_v52   ;;  %p4185_p5 = por %p4184_p7, %p4183_p6 }
 0x24e   : > { %v5744_v47 = vsel %vm704_vm1, %v952_v35, %v963_v46 }
 0x24f   : > { %2052 = vmatpush1.msra.mxu0 %v5744_v47  ;;  %v936_v53 = vpop.permute.xlu1 %935  ;;  %p4186_p3 = pnand %p4185_p5, %p4179_p8 }
 0x250   : > { %v941_v62 = vsel %vm617_vm9, %v936_v53, %v938_v29  ;;  %v940_v63 = vpop.permute.xlu0 %939 }
 0x251   : > { %v942_v2 = vsel %vm617_vm9, %v938_v29, %v940_v63  ;;  %v5751_v22 = vsel %vm704_vm1, %v5186_v44, %v940_v63  ;;  %v5755_v14 = vsel %vm704_vm1, %v5175_v39, %v941_v62 }
 0x252   : > { %3586 = vmatpush3.msra.mxu1 %v5751_v22  ;;  %v5760_v17 = vsel %vm704_vm1, %v5190_v45, %v942_v2 }
 0x253   : > { %2053 = vmatprep.subr.mxu0 %v5760_v17  ;;  %3590 = vmatprep.subr.mxu1 %v4451_v0  ;;  %v5764_v1 = vpop.permute.xlu1 %1121 }
 0x254   : > { %2054 = vmatpush1.msra.mxu0 %v5755_v14  ;;  %3588 = vmatmul.mubr.msk.f32.vlgmr.msra.gmra.mxu1 %vm1244_vm10, %v5555_v15  ;;  %v5769_v44 = vpop.permute.xlu0 %1119 }
 0x255   : > { %3591 = vmatpush3.msk.msra.mxu1 %vm704_vm1, %v5403_v8  ;;  %3399 = vmatprep.subr.msk.mxu0 %vm704_vm1, %v5409_v7 }
 0x256   : > { %3592 = vmatprep.subr.mxu1 %v4451_v0  ;;  %3393 = vmatmul.mubr.msk.f32.vlgmr.msra.gmra.mxu0 %vm1244_vm10, %v5555_v15 }
 0x257   : > { %3400 = vmatpush1.msk.msra.mxu0 %vm704_vm1, %v5443_v37  ;;  %3593 = vmatpush3.msra.mxu1 %v5432_v31  ;;  %v1100_v39 = vpop.permute.xlu1 %1099 }
 0x258   : > { %2199 = vmatprep.subr.mxu0 %v5450_v38  ;;  %3594 = vmatprep.subr.mxu1 %v4451_v0  ;;  %v5783_v45 = vpop.permute.xlu0 %1097 }
 0x259   : > { %2200 = vmatpush1.msra.mxu0 %v5460_v51  ;;  %3595 = vmatpush3.msra.mxu1 %v5476_v61 }
 0x25a   : > { %2201 = vmatprep.subr.mxu0 %v5482_v4  ;;  %3596 = vmatprep.subr.mxu1 %v4451_v0 }
 0x25b   : > { %2202 = vmatpush1.msra.mxu0 %v5503_v57  ;;  %3597 = vmatpush3.msra.mxu1 %v5517_v33  ;;  %v1111_v8 = vpop.permute.xlu1 %1110  ;;  %v5833_v57 = vsel %vm701_vm2, %v5769_v44, %v5764_v1  ;;  %v1102_v33 = vsel %vm677_vm4, %v5783_v45, %v1100_v39 }
 0x25c   : > { %2203 = vmatprep.subr.mxu0 %v5525_v34  ;;  %3598 = vmatprep.subr.mxu1 %v4451_v0  ;;  %v1109_v7 = vpop.permute.xlu0 %1108 }
 0x25d   : > { %2204 = vmatpush1.msra.mxu0 %v5536_v50  ;;  %3599 = vmatpush3.msra.mxu1 %v5547_v60  ;;  %v1113_v34 = vsel %vm689_vm3, %v1109_v7, %v1111_v8  ;;  %v5842_v60 = vsel %vm704_vm1, %v1100_v39, %v1111_v8 }
 0x25e   : > { %2205 = vmatprep.subr.mxu0 %v5562_v16  ;;  %3600 = vmatprep.mubr.msk.f32.mxu1 %vm4459_vm0, %v4451_v0  ;;  %v5867_v40 = vsel %vm704_vm1, %v1102_v33, %v1113_v34 }
 0x25f   : > { %3603 = vmatprep.subr.mxu1 %v4451_v0  ;;  %2206 = vmatpush1.msra.mxu0 %v5553_v10  ;;  %v1096_v31 = vpop.permute.xlu1 %1095 }
 0x260   : > { %3601 = vmatmul.mubr.msk.f32.vlgmr.msra.gmra.mxu1 %vm1244_vm10, %v5238_v19  ;;  %2239 = vmatprep.mubr.f32.mxu0 %v4451_v0  ;;  %v1118_v37 = vpop.permute.xlu0 %1117  ;;  %v1101_v36 = vsel %vm677_vm4, %v1096_v31, %v5783_v45 }
 0x261   : > { %3604 = vmatpush3.msk.msra.mxu1 %vm704_vm1, %v5566_v13  ;;  %3404 = vmatprep.subr.msk.mxu0 %vm704_vm1, %v5659_v21  ;;  %v5852_v25 = vsel %vm701_vm2, %v1118_v37, %v5769_v44 }
 0x262   : > { %3605 = vmatprep.subr.mxu1 %v4451_v0  ;;  %3401 = vmatmul.mubr.msk.f32.vlgmr.msra.gmra.mxu0 %vm1244_vm10, %v5238_v19 }
 0x263   : > { %3405 = vmatpush1.msk.msra.mxu0 %vm704_vm1, %v5683_v27  ;;  %3606 = vmatpush3.msra.mxu1 %v5674_v18  ;;  %v1076_v38 = vpop.permute.xlu1 %1075 }
 0x264   : > { %2347 = vmatprep.subr.mxu0 %v5690_v28  ;;  %3607 = vmatprep.subr.mxu1 %v4451_v0  ;;  %v1107_v51 = vpop.permute.xlu0 %1106 }
 0x265   : > { %2348 = vmatpush1.msra.mxu0 %v5706_v55  ;;  %3608 = vmatpush3.msra.mxu1 %v5701_v43  ;;  %v1112_v10 = vsel %vm689_vm3, %v1107_v51, %v1109_v7 }
 0x266   : > { %2349 = vmatprep.subr.mxu0 %v5710_v56  ;;  %3609 = vmatprep.subr.mxu1 %v4451_v0  ;;  %v5874_v11 = vsel %vm704_vm1, %v1101_v36, %v1112_v10 }
 0x267   : > { %2350 = vmatpush1.msra.mxu0 %v5716_v59  ;;  %3610 = vmatpush3.msra.mxu1 %v5725_v24  ;;  %v1087_v19 = vpop.permute.xlu1 %1086 }
 0x268   : > { %2351 = vmatprep.subr.mxu0 %v5731_v6  ;;  %3611 = vmatprep.subr.mxu1 %v4451_v0  ;;  %v1078_v61 = vpop.permute.xlu0 %1077 }
 0x269   : > { %2352 = vmatpush1.msra.mxu0 %v5744_v47  ;;  %3612 = vmatpush3.msra.mxu1 %v5751_v22  ;;  %v1080_v26 = vsel %vm653_vm5, %v1076_v38, %v1078_v61 }
 0x26a   : > { %2353 = vmatprep.subr.mxu0 %v5760_v17  ;;  %3613 = vmatprep.mubr.msk.f32.mxu1 %vm4459_vm0, %v4451_v0 }
 0x26b   : > { %3616 = vmatprep.subr.mxu1 %v4451_v0  ;;  %2354 = vmatpush1.msra.mxu0 %v5755_v14  ;;  %v1074_v4 = vpop.permute.xlu1 %1073 }
 0x26c   : > { %3614 = vmatmul.mubr.msk.f32.vlgmr.msra.gmra.mxu1 %vm1244_vm10, %v5398_v23  ;;  %2387 = vmatprep.mubr.f32.mxu0 %v4451_v0  ;;  %v1089_v50 = vpop.permute.xlu0 %1088  ;;  %v1079_v20 = vsel %vm653_vm5, %v1074_v4, %v1076_v38 }
 0x26d   : > { %3617 = vmatpush3.msk.msra.mxu1 %vm704_vm1, %v5764_v1  ;;  %3409 = vmatprep.subr.msk.mxu0 %vm704_vm1, %v5833_v57  ;;  %v1091_v16 = vsel %vm665_vm6, %v1087_v19, %v1089_v50  ;;  %v5859_v32 = vsel %vm704_vm1, %v1078_v61, %v1089_v50 }
 0x26e   : > { %3618 = vmatprep.subr.mxu1 %v4451_v0  ;;  %3406 = vmatmul.mubr.msk.f32.vlgmr.msra.gmra.mxu0 %vm1244_vm10, %v5398_v23  ;;  %v5870_v42 = vsel %vm704_vm1, %v1080_v26, %v1091_v16 }
 0x26f   : > { %3410 = vmatpush1.msk.msra.mxu0 %vm704_vm1, %v5852_v25  ;;  %3619 = vmatpush3.msra.mxu1 %v5842_v60  ;;  %v1054_v54 = vpop.permute.xlu1 %1053 }
 0x270   : > { %2501 = vmatprep.subr.mxu0 %v5867_v40  ;;  %3620 = vmatprep.subr.mxu1 %v4451_v0  ;;  %v1085_v12 = vpop.permute.xlu0 %1084 }
 0x271   : > { %2502 = vmatpush1.msra.mxu0 %v5874_v11  ;;  %3621 = vmatpush3.msra.mxu1 %v5859_v32  ;;  %v1090_v3 = vsel %vm665_vm6, %v1085_v12, %v1087_v19 }
 0x272   : > { %2503 = vmatprep.subr.mxu0 %v5870_v42  ;;  %v5883_v52 = vsel %vm704_vm1, %v1079_v20, %v1090_v3  ;;  %3622 = vmatprep.subr.mxu1 %v4451_v0 }
 0x273   : > { %2504 = vmatpush1.msra.mxu0 %v5883_v52  ;;  %v1065_v29 = vpop.permute.xlu1 %1064  ;;  %3626 = vmatprep.mubr.msk.f32.mxu1 %vm4459_vm0, %v4451_v0 }
 0x274   : > { %v1056_v30 = vpop.permute.xlu0 %1055  ;;  %2541 = vmatprep.mubr.f32.mxu0 %v4451_v0 }
 0x275   : > { %v1058_v53 = vsel %vm629_vm7, %v1054_v54, %v1056_v30 }
 0x277   : > { %v1052_v35 = vpop.permute.xlu1 %1051 }
 0x278   : > { %v1067_v46 = vpop.permute.xlu0 %1066  ;;  %v1057_v45 = vsel %vm629_vm7, %v1052_v35, %v1054_v54 }
 0x279   : > { %v1069_v62 = vsel %vm641_vm8, %v1065_v29, %v1067_v46  ;;  %v5893_v63 = vsel %vm704_vm1, %v1056_v30, %v1067_v46 }
 0x27a   : > { %3623 = vmatpush3.msra.mxu1 %v5893_v63  ;;  %v5897_v2 = vsel %vm704_vm1, %v1058_v53, %v1069_v62 }
 0x27b   : > { %2505 = vmatprep.subr.mxu0 %v5897_v2  ;;  %v1043_v44 = vpop.permute.xlu1 %1042  ;;  %3624 = vmatprep.subr.mxu1 %v4451_v0 }
 0x27c   : > { %v1063_v39 = vpop.permute.xlu0 %1062 }
 0x27d   : > { %v1068_v8 = vsel %vm641_vm8, %v1063_v39, %v1065_v29 }
 0x27e   : > { %v5904_v7 = vsel %vm704_vm1, %v1057_v45, %v1068_v8 }
 0x27f   : > { %2506 = vmatpush1.msra.mxu0 %v5904_v7  ;;  %v1041_v31 = vpop.permute.xlu1 %1040 }
 0x280   : > { %v1046_v37 = vsel %vm617_vm9, %v1041_v31, %v1043_v44  ;;  %v1045_v38 = vpop.permute.xlu0 %1044 }
 0x281   : > { %v1047_v51 = vsel %vm617_vm9, %v1043_v44, %v1045_v38  ;;  %v1127_v19 = vsel %vm704_vm1, %v5327_v48, %v1045_v38  ;;  %v5913_v61 = vsel %vm704_vm1, %v5309_v41, %v1046_v37 }
 0x282   : > { %3625 = vmatpush3.msra.mxu1 %v1127_v19  ;;  %v1126_v4 = vsel %vm704_vm1, %v5331_v49, %v1047_v51 }
 0x283   : > { %2507 = vmatprep.subr.mxu0 %v1126_v4  ;;  %3629 = vmatprep.subr.mxu1 %v4451_v0  ;;  %v5918_v33 = vpop.permute.xlu1 %1226 }
 0x284   : > { %2508 = vmatpush1.msra.mxu0 %v5913_v61  ;;  %3627 = vmatmul.mubr.msk.f32.vlgmr.msra.gmra.mxu1 %vm1244_vm10, %v5555_v15  ;;  %v5923_v34 = vpop.permute.xlu0 %1224  ;;  %v5929_v41 = vpop.f32.mrf.mxu1 }
 0x285   : > { %3630 = vmatpush3.msk.msra.mxu1 %vm704_vm1, %v5566_v13  ;;  %3417 = vmatprep.subr.msk.mxu0 %vm704_vm1, %v5659_v21 }
 0x286   : > { %3631 = vmatprep.subr.mxu1 %v4451_v0  ;;  %3411 = vmatmul.mubr.msk.f32.vlgmr.msra.gmra.mxu0 %vm1244_vm10, %v5555_v15  ;;  %v3524_v49 = vpop.f32.mrf.mxu1 }
 0x287   : > { %3418 = vmatpush1.msk.msra.mxu0 %vm704_vm1, %v5683_v27  ;;  %3632 = vmatpush3.msra.mxu1 %v5674_v18  ;;  %v1205_v48 = vpop.permute.xlu1 %1204  ;;  %v2625_v27 = vld [vmem:[#allocation13] sm:$0xff] }
 0x288   : > { %2653 = vmatprep.subr.mxu0 %v5690_v28  ;;  %3633 = vmatprep.subr.mxu1 %v4451_v0  ;;  %v1203_v13 = vpop.permute.xlu0 %1202 }
 0x289   : > { %2654 = vmatpush1.msra.mxu0 %v5706_v55  ;;  %3634 = vmatpush3.msra.mxu1 %v5701_v43 }
 0x28a   : > { %2655 = vmatprep.subr.mxu0 %v5710_v56  ;;  %3635 = vmatprep.subr.mxu1 %v4451_v0 }
 0x28b   : > { %2656 = vmatpush1.msra.mxu0 %v5716_v59  ;;  %3636 = vmatpush3.msra.mxu1 %v5725_v24  ;;  %v1216_v21 = vpop.permute.xlu1 %1215 }
 0x28c   : > { %2657 = vmatprep.subr.mxu0 %v5731_v6  ;;  %3637 = vmatprep.subr.mxu1 %v4451_v0  ;;  %v1214_v18 = vpop.permute.xlu0 %1213 }
 0x28d   : > { %2658 = vmatpush1.msra.mxu0 %v5744_v47  ;;  %3638 = vmatpush3.msra.mxu1 %v5751_v22  ;;  %v1218_v6 = vsel %vm689_vm3, %v1214_v18, %v1216_v21  ;;  %v1229_v47 = vsel %vm701_vm2, %v5923_v34, %v5918_v33  ;;  %v1207_v22 = vsel %vm677_vm4, %v1203_v13, %v1205_v48 }
 0x28e   : > { %2659 = vmatprep.subr.mxu0 %v5760_v17  ;;  %3639 = vmatprep.mubr.msk.f32.mxu1 %vm4459_vm0, %v4451_v0  ;;  %v1240_v50 = vsel %vm704_vm1, %v1207_v22, %v1218_v6 }
 0x28f   : > { %3642 = vmatprep.subr.mxu1 %v4451_v0  ;;  %2660 = vmatpush1.msra.mxu0 %v5755_v14  ;;  %v1201_v28 = vpop.permute.xlu1 %1200  ;;  %v1241_v14 = vsel %vm704_vm1, %v1205_v48, %v1216_v21 }
 0x290   : > { %3640 = vmatmul.mubr.msk.f32.vlgmr.msra.gmra.mxu1 %vm1244_vm10, %v2625_v27  ;;  %2693 = vmatprep.mubr.f32.mxu0 %v4451_v0  ;;  %v1223_v43 = vpop.permute.xlu0 %1222 }
 0x291   : > { %3643 = vmatpush3.msk.msra.mxu1 %vm704_vm1, %v5764_v1  ;;  %3422 = vmatprep.subr.msk.mxu0 %vm704_vm1, %v5833_v57  ;;  %v1206_v1 = vsel %vm677_vm4, %v1201_v28, %v1203_v13  ;;  %v1228_v57 = vsel %vm701_vm2, %v1223_v43, %v5923_v34 }
 0x292   : > { %3644 = vmatprep.subr.mxu1 %v4451_v0  ;;  %3419 = vmatmul.mubr.msk.f32.vlgmr.msra.gmra.mxu0 %vm1244_vm10, %v2625_v27 }
 0x293   : > { %3423 = vmatpush1.msk.msra.mxu0 %vm704_vm1, %v5852_v25  ;;  %3645 = vmatpush3.msra.mxu1 %v5842_v60  ;;  %v1181_v55 = vpop.permute.xlu1 %1180 }
 0x294   : > { %2801 = vmatprep.subr.mxu0 %v5867_v40  ;;  %3646 = vmatprep.subr.mxu1 %v4451_v0  ;;  %v1212_v56 = vpop.permute.xlu0 %1211 }
 0x295   : > { %2802 = vmatpush1.msra.mxu0 %v5874_v11  ;;  %3647 = vmatpush3.msra.mxu1 %v5859_v32  ;;  %v1217_v17 = vsel %vm689_vm3, %v1212_v56, %v1214_v18 }
 0x296   : > { %2803 = vmatprep.subr.mxu0 %v5870_v42  ;;  %3648 = vmatprep.subr.mxu1 %v4451_v0  ;;  %v1239_v32 = vsel %vm704_vm1, %v1206_v1, %v1217_v17 }
 0x297   : > { %2804 = vmatpush1.msra.mxu0 %v5883_v52  ;;  %3649 = vmatpush3.msra.mxu1 %v5893_v63 }
 0x298   : > { %2805 = vmatprep.subr.mxu0 %v5897_v2  ;;  %3650 = vmatprep.subr.mxu1 %v4451_v0  ;;  %v1192_v59 = vpop.permute.xlu1 %1191 }
 0x299   : > { %2806 = vmatpush1.msra.mxu0 %v5904_v7  ;;  %3651 = vmatpush3.msra.mxu1 %v1127_v19  ;;  %v1183_v24 = vpop.permute.xlu0 %1182  ;;  %v1320_v19 = vpop.f32.mrf.mxu0 }
 0x29a   : > { %2807 = vmatprep.subr.mxu0 %v1126_v4  ;;  %3652 = vmatprep.mubr.msk.f32.mxu1 %vm4459_vm0, %v4451_v0  ;;  %v1185_v16 = vsel %vm653_vm5, %v1181_v55, %v1183_v24 }
 0x29b   : > { %3655 = vmatprep.subr.mxu1 %v4451_v0  ;;  %2808 = vmatpush1.msra.mxu0 %v5913_v61  ;;  %v1322_v61 = vpop.f32.mrf.mxu0 }
 0x29c   : > { %3653 = vmatmul.mubr.msk.f32.vlgmr.msra.gmra.mxu1 %vm1244_vm10, %v5398_v23  ;;  %2841 = vmatprep.mubr.f32.mxu0 %v4451_v0 }
 0x29d   : > { %3656 = vmatpush3.msk.msra.mxu1 %vm704_vm1, %v5918_v33  ;;  %3427 = vmatprep.subr.msk.mxu0 %vm704_vm1, %v1229_v47 }
 0x29e   : > { %3657 = vmatprep.subr.mxu1 %v4451_v0  ;;  %3424 = vmatmul.mubr.msk.f32.vlgmr.msra.gmra.mxu0 %vm1244_vm10, %v5398_v23  ;;  %v1179_v60 = vpop.permute.xlu1 %1178  ;;  %v1194_v10 = vpop.permute.xlu0 %1193 }
 0x29f   : > { %3428 = vmatpush1.msk.msra.mxu0 %vm704_vm1, %v1228_v57  ;;  %3658 = vmatpush3.msra.mxu1 %v1241_v14  ;;  %v1196_v25 = vsel %vm665_vm6, %v1192_v59, %v1194_v10  ;;  %v1238_v26 = vsel %vm704_vm1, %v1183_v24, %v1194_v10  ;;  %v1184_v42 = vsel %vm653_vm5, %v1179_v60, %v1181_v55 }
 0x2a0   : > { %2955 = vmatprep.subr.mxu0 %v1240_v50  ;;  %3659 = vmatprep.subr.mxu1 %v4451_v0  ;;  %v1237_v23 = vsel %vm704_vm1, %v1185_v16, %v1196_v25 }
 0x2a1   : > { %2956 = vmatpush1.msra.mxu0 %v1239_v32  ;;  %3660 = vmatpush3.msra.mxu1 %v1238_v26 }
 0x2a2   : > { %2957 = vmatprep.subr.mxu0 %v1237_v23  ;;  %3661 = vmatprep.subr.mxu1 %v4451_v0 }
 0x2a3   : > { %3665 = vmatprep.mubr.msk.f32.mxu1 %vm4459_vm0, %v4451_v0  ;;  %2995 = vmatprep.mubr.f32.mxu0 %v4451_v0  ;;  %v1159_v36 = vpop.permute.xlu1 %1158 }
 0x2a4   : > { %v1190_v40 = vpop.permute.xlu0 %1189 }
 0x2a5   : > { %v1195_v54 = vsel %vm665_vm6, %v1190_v40, %v1192_v59 }
 0x2a6   : > { %v1236_v11 = vsel %vm704_vm1, %v1184_v42, %v1195_v54 }
 0x2a7   : > { %2958 = vmatpush1.msra.mxu0 %v1236_v11 }
 0x2aa   : > { %v1170_v12 = vpop.permute.xlu1 %1169  ;;  %v1161_v20 = vpop.permute.xlu0 %1160 }
 0x2ab   : > { %v1163_v29 = vsel %vm629_vm7, %v1159_v36, %v1161_v20 }
 0x2af   : > { %v1157_v3 = vpop.permute.xlu1 %1156  ;;  %v1172_v52 = vpop.permute.xlu0 %1171 }
 0x2b0   : > { %v1174_v30 = vsel %vm641_vm8, %v1170_v12, %v1172_v52  ;;  %v1235_v35 = vsel %vm704_vm1, %v1161_v20, %v1172_v52  ;;  %v1162_v2 = vsel %vm629_vm7, %v1157_v3, %v1159_v36 }
 0x2b1   : > { %3662 = vmatpush3.msra.mxu1 %v1235_v35  ;;  %v1234_v46 = vsel %vm704_vm1, %v1163_v29, %v1174_v30 }
 0x2b2   : > { %2959 = vmatprep.subr.mxu0 %v1234_v46  ;;  %3663 = vmatprep.subr.mxu1 %v4451_v0 }
 0x2b4   : > { %v1551_v53 = vpop.f32.mrf.mxu1 }
 0x2b5   : > { %v1148_v62 = vpop.permute.xlu1 %1147 }
 0x2b6   : > { %v1168_v63 = vpop.permute.xlu0 %1167  ;;  %v3537_v39 = vpop.f32.mrf.mxu1 }
 0x2b7   : > { %v1173_v44 = vsel %vm641_vm8, %v1168_v63, %v1170_v12 }
 0x2b8   : > { %v1233_v45 = vsel %vm704_vm1, %v1162_v2, %v1173_v44 }
 0x2b9   : > { %2960 = vmatpush1.msra.mxu0 %v1233_v45  ;;  %v1146_v8 = vpop.permute.xlu1 %1145 }
 0x2ba   : > { %v1151_v7 = vsel %vm617_vm9, %v1146_v8, %v1148_v62  ;;  %v1150_v31 = vpop.permute.xlu0 %1149 }
 0x2bb   : > { %v1152_v37 = vsel %vm617_vm9, %v1148_v62, %v1150_v31  ;;  %v1232_v0 = vsel %vm704_vm1, %v5489_v5, %v1150_v31  ;;  %v1230_v38 = vsel %vm704_vm1, %v5471_v58, %v1151_v7  ;;  %v1480_v58 = vpop.f32.mrf.mxu0 }
 0x2bc   : > { %3664 = vmatpush3.msra.mxu1 %v1232_v0  ;;  %v1231_v51 = vsel %vm704_vm1, %v5493_v9, %v1152_v37 }
 0x2bd   : > { %2961 = vmatprep.subr.mxu0 %v1231_v51  ;;  %3666 = vmatmul.mubr.msk.f32.vlgmr.msra.gmra.mxu1 %vm1244_vm10, %v5555_v15  ;;  %v1482_v48 = vpop.f32.mrf.mxu0 }
 0x2be   : > { %2962 = vmatpush1.msra.mxu0 %v1230_v38 }
 0x2bf   : > { %3429 = vmatmul.mubr.msk.f32.vlgmr.msra.gmra.mxu0 %vm1244_vm10, %v5555_v15 }
 0x2c8   : > { %v6034_v4 = vpop.permute.xlu0 %1397 }
 0x2c9   : > { %v1402_v5 = vadd.f32 %v6034_v4, %v5929_v41  ;;  %v1400_v33 = vadd.f32 %v6034_v4, %v1320_v19  ;;  %v1401_v34 = vadd.f32 %v6034_v4, %v1322_v61 }
 0x2cb   : > { %v1557_v9 = vadd.f32 %v1551_v53, %v1402_v5  ;;  %v1555_v49 = vadd.f32 %v1480_v58, %v1400_v33  ;;  %v1556_v21 = vadd.f32 %v1482_v48, %v1401_v34 }
 0x2e4   : > { %v1706_v13 = vpop.f32.mrf.mxu1 }
 0x2e5   : > { %v1712_v15 = vadd.f32 %v1706_v13, %v1557_v9 }
 0x2e6   : > { %v3550_v18 = vpop.f32.mrf.mxu1 }
 0x2e7   : > { %v1635_v27 = vpop.f32.mrf.mxu0  ;;  %1716 = vst.msk [vmem:[%s6043_s5 + $0x10] sm:$0xff] %vm1715_vm11, %v1712_v15 }
 0x2e8   : > { %v1710_v41 = vadd.f32 %v1635_v27, %v1555_v49 }
 0x2e9   : > { %v1637_v28 = vpop.f32.mrf.mxu0 }
 0x2ea   : > { %1713 = vst [vmem:[%s6043_s5] sm:$0xff] %v1710_v41  ;;  %v1711_v43 = vadd.f32 %v1637_v28, %v1556_v21 }
 0x2ec   : > { %1714 = vst [vmem:[%s6043_s5 + $0x8] sm:$0xff] %v1711_v43 }
 0x2f3   : > { %v1858_v55 = vpop.f32.mrf.mxu1 }
 0x2f4   : > { %v1864_v22 = vadd.f32 %v1858_v55, %v6034_v4 }
 0x2f5   : > { %v3563_v56 = vpop.f32.mrf.mxu1  ;;  %v1787_v6 = vpop.f32.mrf.mxu0 }
 0x2f6   : > { %v1862_v17 = vadd.f32 %v1787_v6, %v6034_v4 }
 0x2f7   : > { %v1789_v47 = vpop.f32.mrf.mxu0 }
 0x2f8   : > { %v1863_v1 = vadd.f32 %v1789_v47, %v6034_v4 }
 0x301   : > { %v2006_v59 = vpop.f32.mrf.mxu1 }
 0x302   : > { %v2012_v57 = vadd.f32 %v2006_v59, %v1864_v22 }
 0x303   : > { %v3576_v24 = vpop.f32.mrf.mxu1 }
 0x304   : > { %v1935_v14 = vpop.f32.mrf.mxu0 }
 0x305   : > { %v2010_v60 = vadd.f32 %v1935_v14, %v1862_v17 }
 0x306   : > { %v1937_v50 = vpop.f32.mrf.mxu0 }
 0x307   : > { %v2011_v16 = vadd.f32 %v1937_v50, %v1863_v1 }
 0x314   : > { %v2160_v10 = vpop.f32.mrf.mxu1 }
 0x315   : > { %v2166_v25 = vadd.f32 %v2160_v10, %v2012_v57 }
 0x316   : > { %v2089_v26 = vpop.f32.mrf.mxu0  ;;  %v3589_v32 = vpop.f32.mrf.mxu1 }
 0x317   : > { %v2164_v23 = vadd.f32 %v2089_v26, %v2010_v60  ;;  %3398 = vst.msk [vmem:[%s6043_s5 + $0x28] sm:$0xff] %vm1715_vm11, %v2166_v25 }
 0x318   : > { %v2091_v36 = vpop.f32.mrf.mxu0 }
 0x319   : > { %3396 = vst [vmem:[%s6043_s5 + $0x18] sm:$0xff] %v2164_v23  ;;  %v2165_v40 = vadd.f32 %v2091_v36, %v2011_v16 }
 0x31b   : > { %3397 = vst [vmem:[%s6043_s5 + $0x20] sm:$0xff] %v2165_v40 }
 0x320   : > { %v2312_v42 = vpop.f32.mrf.mxu1 }
 0x321   : > { %v2318_v52 = vadd.f32 %v2312_v42, %v6034_v4 }
 0x322   : > { %v3602_v54 = vpop.f32.mrf.mxu1  ;;  %v2241_v20 = vpop.f32.mrf.mxu0 }
 0x323   : > { %v2316_v30 = vadd.f32 %v2241_v20, %v6034_v4 }
 0x324   : > { %v2243_v3 = vpop.f32.mrf.mxu0 }
 0x325   : > { %v2317_v35 = vadd.f32 %v2243_v3, %v6034_v4 }
 0x32c   : > { %v2460_v11 = vpop.f32.mrf.mxu1 }
 0x32d   : > { %v2466_v46 = vadd.f32 %v2460_v11, %v2318_v52 }
 0x32e   : > { %v3615_v12 = vpop.f32.mrf.mxu1  ;;  %v2389_v29 = vpop.f32.mrf.mxu0 }
 0x32f   : > { %v2464_v62 = vadd.f32 %v2389_v29, %v2316_v30 }
 0x330   : > { %v2391_v53 = vpop.f32.mrf.mxu0 }
 0x331   : > { %v2465_v2 = vadd.f32 %v2391_v53, %v2317_v35 }
 0x344   : > { %v2614_v63 = vpop.f32.mrf.mxu1 }
 0x345   : > { %v2620_v44 = vadd.f32 %v2614_v63, %v2466_v46 }
 0x346   : > { %v2543_v39 = vpop.f32.mrf.mxu0  ;;  %v3628_v45 = vpop.f32.mrf.mxu1 }
 0x347   : > { %v2618_v8 = vadd.f32 %v2543_v39, %v2464_v62  ;;  %3416 = vst.msk [vmem:[%s6043_s5 + $0x40] sm:$0xff] %vm1715_vm11, %v2620_v44 }
 0x348   : > { %v2545_v7 = vpop.f32.mrf.mxu0 }
 0x349   : > { %3414 = vst [vmem:[%s6043_s5 + $0x30] sm:$0xff] %v2618_v8  ;;  %v2619_v31 = vadd.f32 %v2545_v7, %v2465_v2 }
 0x34b   : > { %3415 = vst [vmem:[%s6043_s5 + $0x38] sm:$0xff] %v2619_v31 }
 0x350   : > { %v2766_v37 = vpop.f32.mrf.mxu1 }
 0x351   : > { %v2772_v5 = vadd.f32 %v2766_v37, %v6034_v4 }
 0x352   : > { %v3641_v0 = vpop.f32.mrf.mxu1  ;;  %v2695_v19 = vpop.f32.mrf.mxu0 }
 0x353   : > { %v2770_v33 = vadd.f32 %v2695_v19, %v6034_v4 }
 0x354   : > { %v2697_v61 = vpop.f32.mrf.mxu0 }
 0x355   : > { %v2771_v9 = vadd.f32 %v2697_v61, %v6034_v4 }
 0x35c   : > { %v2914_v38 = vpop.f32.mrf.mxu1 }
 0x35d   : > { %v2920_v34 = vadd.f32 %v2914_v38, %v2772_v5 }
 0x35e   : > { %v3654_v51 = vpop.f32.mrf.mxu1  ;;  %v2843_v58 = vpop.f32.mrf.mxu0 }
 0x35f   : > { %v2918_v13 = vadd.f32 %v2843_v58, %v2770_v33 }
 0x360   : > { %v2845_v48 = vpop.f32.mrf.mxu0 }
 0x361   : > { %v2919_v27 = vadd.f32 %v2845_v48, %v2771_v9 }
 0x37d   : > { %v3068_v49 = vpop.f32.mrf.mxu1 }
 0x37e   : > { %v3074_v15 = vadd.f32 %v3068_v49, %v2920_v34 }
 0x37f   : > { %v2997_v21 = vpop.f32.mrf.mxu0  ;;  %v3667_v18 = vpop.f32.mrf.mxu1 }
 0x380   : > { %3434 = vst.msk [vmem:[%s6043_s5 + $0x58] sm:$0xff] %vm1715_vm11, %v3074_v15  ;;  %v3072_v41 = vadd.f32 %v2997_v21, %v2918_v13 }
 0x381   : > { %v2999_v28 = vpop.f32.mrf.mxu0 }
 0x382   : > { %3432 = vst [vmem:[%s6043_s5 + $0x48] sm:$0xff] %v3072_v41  ;;  %v3073_v4 = vadd.f32 %v2999_v28, %v2919_v27 }
 0x384   : > { %3433 = vst [vmem:[%s6043_s5 + $0x50] sm:$0xff] %v3073_v4 }
 0x385   : > { %4189 = shalt.err (!%p4186_p3)
}
 0x386   : > { %s4190_s7 = scalar_lea.hbm %s6074_s18, 1536  ;;  %s4194_s21 = scalar_lea.hbm %s6336_s2, 6144 }
 0x387   : > { %p4191_p13 = scmp.ne.s32.totalorder %s6074_s18, %s4190_s7  ;;  %p4195_p11 = scmp.lt.s32.totalorder %s6074_s18, %s6336_s2 }
 0x388   : > { %p4196_p0 = scmp.lt.s32.totalorder %s4194_s21, %s4190_s7 }
 0x389   : > { %p4192_p2 = pnand %p4191_p13, %p6337_p1 }
 0x38a   : > { %p4197_p12 = por %p4196_p0, %p4195_p11 }
 0x38b   : > { %p4193_p4 = pneg %p4192_p2 }
 0x38d   : > { %p4198_p10 = pnand %p4197_p12, %p4193_p4 }
 0x38f   : > { %4201 = shalt.err (!%p4198_p10)
}
 0x390   : > { %s4463_s14 = smov 384   ;;  %s4464_s29 = smov 24  }
 0x391   : > { %3701 = dma.vmem_to_hbm [thread:$0]  (%p6337_p1), %s6076_s9, 1536, %s6074_s18, %s6082_s17, %s4463_s14, %s4463_s14, %s4464_s29  }
 0x392 PF: > { %s6338_s10 = sld [smem:[#allocation23_spill]]  ;;  %p3733_p9 = scmp.ge.s32.totalorder %s4440_s4, 2 }
 0x393   : > { %s6339_s11 = sld [smem:[#allocation48_spill]] }
 0x398   : > { %s3111_s23 = sand.u32 1, %s6338_s10  }
 0x399   : > { %p6340_p8 = scmp.ne.s32.totalorder %s6339_s11, 0  ;;  %s3112_s3 = scalar_lea.sflag [#allocation4], %s3111_s23 }
 0x39b   : > { %p3727_p6 = pnand %p3733_p9, %p6340_p8 }
 0x39d   : > { %p3728_p7 = pneg %p3727_p6 }
 0x39f   : > { %4335 = dma.done.wait (%p3728_p7), %s3112_s3, 1536  }
 0x3a0   : > { %4337 = vsyncadd (%p3728_p7), %s3112_s3, 4294965760  ;;  %s33_s4 = sadd.s32 1, %s4440_s4   ;;  %s6342_s27 = sld [smem:[#allocation24_spill]] }
 0x3a1   : > { %p6110_p5 = scmp.ge.s32.totalorder %s33_s4, 6   ;;  %s6343_s28 = sld [smem:[#allocation25_spill]] }
 0x3a2   : > { %s6344_s29 = sld [smem:[#allocation46_spill]]  ;;  %s6349_s17 = smov %s4762_s12 }
 0x3a3   : > { %s6345_s30 = sld [smem:[#allocation27_spill]]  ;;  %s6357_s10 = smov %s4911_s22 }
 0x3a4   : > { %s6346_s9 = sld [smem:[#allocation28_spill]]  ;;  %s6363_s14 = smov %s4380_s15 }
 0x3a5   : > { %s6347_s11 = sld [smem:[#allocation30_spill]]  ;;  %s6364_s15 = smov %s4384_s16 }
 0x3a6   : > { %s6348_s18 = sld [smem:[#allocation31_spill]]  ;;  %s6365_s16 = smov %s6349_s17 }
 0x3a7   : > { %s6350_s25 = sld [smem:[#allocation33_spill]]  ;;  %s6370_s23 = smov %s4416_s24 }
 0x3a8   : > { %s6351_s26 = sld [smem:[#allocation50_spill]] }
 0x3a9   : > { %s6352_s20 = sld [smem:[#allocation34_spill]] }
 0x3aa   : > { %s6353_s21 = sld [smem:[#allocation35_spill]] }
 0x3ab   : > { %s6354_s6 = sld [smem:[#allocation45_spill]] }
 0x3ac   : > { %s6355_s7 = sld [smem:[#allocation36_spill]]  ;;  %s6360_s12 = smov %s6348_s18 }
 0x3ad   : > { %s6356_s0 = sld [smem:[#allocation49_spill]]  ;;  %s6366_s17 = smov %s6350_s25 }
 0x3ae   : > { %s6358_s5 = sld [smem:[#allocation39_spill]]  ;;  %s6367_s18 = smov %s4396_s19 }
 0x3af   : > { %s6359_s8 = sld [smem:[#allocation40_spill]]  ;;  %s6368_s19 = smov %s6351_s26 }
 0x3b0   : > { %s6361_s3 = sld [smem:[#allocation42_spill]] }
 0x3b1   : > { %s6362_s2 = sld [smem:[#allocation43_spill]]  ;;  %s6369_s22 = smov %s6354_s6 }
 0x3b2   : > { %s6371_s24 = smov %s6355_s7 }
 0x3b3   : > { %s6372_s25 = smov %s6356_s0  ;;  %32 = sbr.rel (!%p6110_p5) target bundleno = 32 (0x20), region = 167 }
 0x3b4   : > { %s6373_s26 = smov %s6358_s5 }
 0x3b6   : > { %s6374_s7 = smov %s6361_s3 }
 0x3b7   : > { %s6375_s5 = smov %s6362_s2 }
 0x3b8   :  { %3117 = vsyncpa [#allocation3], 1 }
 0x3b9   :  { %3119 = vsyncpa [#allocation3 + $0x1], 1 }
 0x3ba   :  { %3120 = vsyncpa [#allocation6], 1 }
 0x3bb   :  { %3122 = vsyncpa [#allocation6 + $0x1], 1 }
 0x3bc   :  { %3123 = vsyncpa [#allocation9], 1 }
 0x3bd   :  { %3125 = vsyncpa [#allocation9 + $0x1], 1 }
 0x3be   :  { %3126 = vsyncpa [#allocation12], 1 }
 0x3bf   :  { %3128 = vsyncpa [#allocation12 + $0x1], 1 }
 0x3c0   :  { %3129 = vsyncpa [#allocation4], 1 }
 0x3c1   :  { %3131 = vsyncpa [#allocation4 + $0x1], 1 }

</bundles_post_ra>
